<compile_context>
chip_gen: v7x
topology: tpu7x:2x2x1
jax: 0.10.0
libtpu: 0.0.40
codegen_flags: <defaults>
</compile_context>

<pallas_src>
import functools

import jax
import jax.numpy as jnp
from jax.experimental import pallas as pl
from jax.experimental.pallas import tpu as pltpu


# -----------------------------------------------------------------------------
# Pallas kernel: one batch element per grid step.
# -----------------------------------------------------------------------------
def _rpn_head_kernel(x_ref, w3_ref, b3_ref, wh_ref, bh_ref,
                     cls_ref, bbox_ref, *, H, W, C_in, C_mid, A):
    Wp = W + 2                       # padded row width
    Nw = H * Wp                      # "wide" spatial extent (cols 0..W-1 valid)

    # ---- build the zero-padded flat input (bf16, VMEM-local) ---------------
    x = x_ref[0].astype(jnp.bfloat16)                          # (C_in, H, W)
    zcol = jnp.zeros((C_in, H, 2), jnp.bfloat16)
    xw = jnp.concatenate([x, zcol], axis=2).reshape(C_in, Nw)  # rows of (x, 0, 0)
    zend = jnp.zeros((C_in, W + 3), jnp.bfloat16)
    xpad = jnp.concatenate([zend, xw, zend], axis=1)           # (C_in, Nw + 2W + 6)
    # x[h, w] now sits at flat index (h+1)*(W+2) + (w+1); everything else is 0,
    # which exactly reproduces the conv's padding=1 semantics.

    # ---- 3x3 conv as ONE matmul: im2col along K via 9 shifted windows ------
    taps = [xpad[:, dy * Wp + dx: dy * Wp + dx + Nw]
            for dy in range(3) for dx in range(3)]
    patches = jnp.concatenate(taps, axis=0)                    # (9*C_in, Nw)
    acc = jnp.dot(w3_ref[...], patches,
                  preferred_element_type=jnp.float32)          # (C_mid, Nw)
    t = jnp.maximum(acc + b3_ref[...], 0.0)                    # bias + ReLU, f32

    # ---- fused 1x1 heads (cls ++ bbox) --------------------------------------
    heads = jnp.dot(wh_ref[...], t.astype(jnp.bfloat16),
                    preferred_element_type=jnp.float32) + bh_ref[...]  # (5A, Nw)
    heads = heads.reshape(5 * A, H, Wp)[:, :, :W]              # drop 2 pad cols

    cls_ref[0] = heads[:A].astype(cls_ref.dtype)               # (A, H, W)
    bbox_ref[0] = heads[A:].astype(bbox_ref.dtype)             # (4A, H, W)


def _rpn_head_single_level(x_nchw, kparams):
    """Run the RPN head on a single NCHW feature map (NCHW out)."""
    w3, b3, wh, bh = kparams
    N, C_in, H, W = x_nchw.shape
    C_mid = w3.shape[0]
    A = wh.shape[0] // 5

    kernel = functools.partial(_rpn_head_kernel, H=H, W=W, C_in=C_in,
                               C_mid=C_mid, A=A)
    cls, bbox = pl.pallas_call(
        kernel,
        out_shape=(
            jax.ShapeDtypeStruct((N, A, H, W), x_nchw.dtype),
            jax.ShapeDtypeStruct((N, 4 * A, H, W), x_nchw.dtype),
        ),
        grid_spec=pltpu.PrefetchScalarGridSpec(
            num_scalar_prefetch=0,
            grid=(N,),
            in_specs=[
                pl.BlockSpec((1, C_in, H, W), lambda n: (n, 0, 0, 0)),
                pl.BlockSpec((C_mid, 9 * C_in), lambda n: (0, 0)),
                pl.BlockSpec((C_mid, 1), lambda n: (0, 0)),
                pl.BlockSpec((5 * A, C_mid), lambda n: (0, 0)),
                pl.BlockSpec((5 * A, 1), lambda n: (0, 0)),
            ],
            out_specs=[
                pl.BlockSpec((1, A, H, W), lambda n: (n, 0, 0, 0)),
                pl.BlockSpec((1, 4 * A, H, W), lambda n: (n, 0, 0, 0)),
            ],
        ),
        compiler_params=pltpu.CompilerParams(
            dimension_semantics=("parallel",)),
    )(x_nchw, w3, b3, wh, bh)
    return cls, bbox


# -----------------------------------------------------------------------------
# Module: parameter init + forward over a list of feature maps.
# -----------------------------------------------------------------------------
def init_rpn_head_params(key, in_channels, mid_channels, num_anchors):
    """normal_(std=0.01) weights, zero biases -- PyTorch OIHW layouts."""
    # The PyTorch module declares the 1x1 heads with `in_channels` inputs but
    # feeds them the 3x3 conv output (mid_channels) -> they must match.
    assert in_channels == mid_channels, "RPNHead requires in_channels == mid_channels"
    k1, k2, k3 = jax.random.split(key, 3)
    std = 0.01
    w_conv = std * jax.random.normal(k1, (mid_channels, in_channels, 3, 3), jnp.float32)
    b_conv = jnp.zeros((mid_channels,), jnp.float32)
    w_cls = std * jax.random.normal(k2, (num_anchors, in_channels, 1, 1), jnp.float32)
    b_cls = jnp.zeros((num_anchors,), jnp.float32)
    w_bbox = std * jax.random.normal(k3, (num_anchors * 4, in_channels, 1, 1), jnp.float32)
    b_bbox = jnp.zeros((num_anchors * 4,), jnp.float32)
    return dict(w_conv=w_conv, b_conv=b_conv, w_cls=w_cls, b_cls=b_cls,
                w_bbox=w_bbox, b_bbox=b_bbox)


def _to_kernel_layout(p):
    """PyTorch OIHW params -> layouts used by the Pallas kernel (bf16 weights)."""
    C_mid, C_in = p["w_conv"].shape[:2]
    assert C_in == C_mid, "RPNHead requires in_channels == mid_channels"
    # (C_mid, C_in, 3, 3) -> (C_mid, 3, 3, C_in) -> (C_mid, 9*C_in);
    # K index = (dy*3 + dx)*C_in + c_in, matching the kernel's tap order.
    w3 = jnp.transpose(p["w_conv"], (0, 2, 3, 1)).reshape(C_mid, 9 * C_in)
    w3 = w3.astype(jnp.bfloat16)
    b3 = p["b_conv"][:, None].astype(jnp.float32)                 # (C_mid, 1)
    wh = jnp.concatenate([p["w_cls"][:, :, 0, 0],
                          p["w_bbox"][:, :, 0, 0]], axis=0)       # (5A, C_mid)
    wh = wh.astype(jnp.bfloat16)
    bh = jnp.concatenate([p["b_cls"], p["b_bbox"]])[:, None].astype(jnp.float32)
    return (w3, b3, wh, bh)


def rpn_head_forward(features, params):
    """features: list of NCHW arrays -> (list of logits, list of bbox_reg)."""
    kparams = _to_kernel_layout(params)
    logits, bbox_reg = [], []
    for feature in features:
        cls, bbox = _rpn_head_single_level(feature, kparams)
        logits.append(cls)
        bbox_reg.append(bbox)
    return logits, bbox_reg


# -----------------------------------------------------------------------------
# Pure-JAX reference (lax conv, f32) for the correctness check.
# -----------------------------------------------------------------------------
def _ref_forward_single(x_nchw, p):
    dn = ("NCHW", "OIHW", "NCHW")
    t = jax.lax.conv_general_dilated(x_nchw, p["w_conv"], (1, 1), "SAME",
                                     dimension_numbers=dn)
    t = jnp.maximum(t + p["b_conv"][None, :, None, None], 0.0)
    cls = jax.lax.conv_general_dilated(t, p["w_cls"], (1, 1), "VALID",
                                       dimension_numbers=dn)
    cls = cls + p["b_cls"][None, :, None, None]
    bbox = jax.lax.conv_general_dilated(t, p["w_bbox"], (1, 1), "VALID",
                                        dimension_numbers=dn)
    bbox = bbox + p["b_bbox"][None, :, None, None]
    return cls, bbox


if __name__ == "__main__":
    key = jax.random.PRNGKey(0)
    k_feat1, k_feat2, k_params = jax.random.split(key, 3)

    # Small shapes: batch=2, in_channels == mid_channels = 16, anchors = 3,
    # two FPN-style feature levels (16x16 and 8x8).
    N, C, A = 2, 16, 3
    feats = [
        jax.random.normal(k_feat1, (N, C, 16, 16), jnp.float32),
        jax.random.normal(k_feat2, (N, C, 8, 8), jnp.float32),
    ]

    params = init_rpn_head_params(k_params, in_channels=C, mid_channels=C,
                                  num_anchors=A)

    logits, bbox_reg = rpn_head_forward(feats, params)
    logits = [jax.block_until_ready(l) for l in logits]
    bbox_reg = [jax.block_until_ready(b) for b in bbox_reg]

    # Verify shapes + numerics against the pure-JAX f32 reference.
    # Tolerances are relaxed because the kernel uses bf16 matmul operands
    # (with f32 accumulation).
    for f, l, b in zip(feats, logits, bbox_reg):
        assert l.shape == (N, A, f.shape[2], f.shape[3])
        assert b.shape == (N, 4 * A, f.shape[2], f.shape[3])
        l_ref, b_ref = _ref_forward_single(f, params)
        assert jnp.allclose(l, l_ref, rtol=5e-2, atol=2e-3), "cls mismatch"
        assert jnp.allclose(b, b_ref, rtol=5e-2, atol=2e-3), "bbox mismatch"

    print("KERNEL_OK")
</pallas_src>

<mosaic_0001>
module attributes {stable_mosaic.version = 11 : i64} {
  func.func @_rpn_head_kernel(%arg0: i32, %arg1: memref<1x16x16x16xf32, #tpu.memory_space<vmem>>, %arg2: memref<16x144xbf16, #tpu.memory_space<vmem>>, %arg3: memref<16x1xf32, #tpu.memory_space<vmem>>, %arg4: memref<15x16xbf16, #tpu.memory_space<vmem>>, %arg5: memref<15x1xf32, #tpu.memory_space<vmem>>, %arg6: memref<1x3x16x16xf32, #tpu.memory_space<vmem>>, %arg7: memref<1x12x16x16xf32, #tpu.memory_space<vmem>>) attributes {dimension_semantics = [#tpu.dimension_semantics<parallel>], iteration_bounds = array<i64: 2>, scalar_prefetch = 0 : i64, scratch_operands = 0 : i64, tpu.core_type = #tpu.core_type<tc>, window_params = [{transform_indices = @transform_0, window_bounds = array<i64: 1, 16, 16, 16>}, {pipeline_mode = #tpu.pipeline_mode<synchronous>, transform_indices = @transform_1, window_bounds = array<i64: 16, 144>}, {pipeline_mode = #tpu.pipeline_mode<synchronous>, transform_indices = @transform_2, window_bounds = array<i64: 16, 1>}, {pipeline_mode = #tpu.pipeline_mode<synchronous>, transform_indices = @transform_3, window_bounds = array<i64: 15, 16>}, {pipeline_mode = #tpu.pipeline_mode<synchronous>, transform_indices = @transform_4, window_bounds = array<i64: 15, 1>}, {transform_indices = @transform_5, window_bounds = array<i64: 1, 3, 16, 16>}, {transform_indices = @transform_6, window_bounds = array<i64: 1, 12, 16, 16>}]} {
    %c0 = arith.constant 0 : index
    %c0_0 = arith.constant 0 : index
    %c0_1 = arith.constant 0 : index
    %c0_2 = arith.constant 0 : index
    %0 = vector.load %arg1[%c0, %c0_0, %c0_1, %c0_2] : memref<1x16x16x16xf32, #tpu.memory_space<vmem>>, vector<1x16x16x16xf32>
    %1 = vector.shape_cast %0 : vector<1x16x16x16xf32> to vector<16x16x16xf32>
    %2 = arith.truncf %1 : vector<16x16x16xf32> to vector<16x16x16xbf16>
    %cst = arith.constant 0.000000e+00 : bf16
    %3 = vector.broadcast %cst : bf16 to vector<16x16x2xbf16>
    %4 = tpu.concatenate %2, %3 in 2 : vector<16x16x16xbf16>, vector<16x16x2xbf16> -> vector<16x16x18xbf16>
    %5 = vector.shape_cast %4 : vector<16x16x18xbf16> to vector<16x288xbf16>
    %cst_3 = arith.constant 0.000000e+00 : bf16
    %6 = vector.broadcast %cst_3 : bf16 to vector<16x19xbf16>
    %7 = tpu.concatenate %6, %5, %6 in 1 : vector<16x19xbf16>, vector<16x288xbf16>, vector<16x19xbf16> -> vector<16x326xbf16>
    %8 = vector.extract_strided_slice %7 {offsets = [0, 0], sizes = [16, 288], strides = [1, 1]} : vector<16x326xbf16> to vector<16x288xbf16>
    %9 = vector.extract_strided_slice %7 {offsets = [0, 1], sizes = [16, 288], strides = [1, 1]} : vector<16x326xbf16> to vector<16x288xbf16>
    %10 = vector.extract_strided_slice %7 {offsets = [0, 2], sizes = [16, 288], strides = [1, 1]} : vector<16x326xbf16> to vector<16x288xbf16>
    %11 = vector.extract_strided_slice %7 {offsets = [0, 18], sizes = [16, 288], strides = [1, 1]} : vector<16x326xbf16> to vector<16x288xbf16>
    %12 = vector.extract_strided_slice %7 {offsets = [0, 19], sizes = [16, 288], strides = [1, 1]} : vector<16x326xbf16> to vector<16x288xbf16>
    %13 = vector.extract_strided_slice %7 {offsets = [0, 20], sizes = [16, 288], strides = [1, 1]} : vector<16x326xbf16> to vector<16x288xbf16>
    %14 = vector.extract_strided_slice %7 {offsets = [0, 36], sizes = [16, 288], strides = [1, 1]} : vector<16x326xbf16> to vector<16x288xbf16>
    %15 = vector.extract_strided_slice %7 {offsets = [0, 37], sizes = [16, 288], strides = [1, 1]} : vector<16x326xbf16> to vector<16x288xbf16>
    %16 = vector.extract_strided_slice %7 {offsets = [0, 38], sizes = [16, 288], strides = [1, 1]} : vector<16x326xbf16> to vector<16x288xbf16>
    %17 = tpu.concatenate %8, %9, %10, %11, %12, %13, %14, %15, %16 in 0 : vector<16x288xbf16>, vector<16x288xbf16>, vector<16x288xbf16>, vector<16x288xbf16>, vector<16x288xbf16>, vector<16x288xbf16>, vector<16x288xbf16>, vector<16x288xbf16>, vector<16x288xbf16> -> vector<144x288xbf16>
    %c0_4 = arith.constant 0 : index
    %c0_5 = arith.constant 0 : index
    %18 = vector.load %arg2[%c0_4, %c0_5] : memref<16x144xbf16, #tpu.memory_space<vmem>>, vector<16x144xbf16>
    %cst_6 = arith.constant dense<0.000000e+00> : vector<16x288xf32>
    %19 = tpu.matmul %18, %17, %cst_6 {dimension_numbers = #tpu.dot_dimension_numbers<[1], [0], [0], [1], [0, 0, 1, 1], [], []>} : vector<16x144xbf16>, vector<144x288xbf16>, vector<16x288xf32> -> vector<16x288xf32>
    %c0_7 = arith.constant 0 : index
    %c0_8 = arith.constant 0 : index
    %20 = vector.load %arg3[%c0_7, %c0_8] : memref<16x1xf32, #tpu.memory_space<vmem>>, vector<16x1xf32>
    %21 = vector.broadcast %20 : vector<16x1xf32> to vector<16x288xf32>
    %22 = arith.addf %19, %21 : vector<16x288xf32>
    %cst_9 = arith.constant 0.000000e+00 : f32
    %23 = vector.broadcast %cst_9 : f32 to vector<16x288xf32>
    %24 = arith.maximumf %22, %23 : vector<16x288xf32>
    %c0_10 = arith.constant 0 : index
    %c0_11 = arith.constant 0 : index
    %25 = vector.load %arg4[%c0_10, %c0_11] : memref<15x16xbf16, #tpu.memory_space<vmem>>, vector<15x16xbf16>
    %26 = arith.truncf %24 : vector<16x288xf32> to vector<16x288xbf16>
    %cst_12 = arith.constant dense<0.000000e+00> : vector<15x288xf32>
    %27 = tpu.matmul %25, %26, %cst_12 {dimension_numbers = #tpu.dot_dimension_numbers<[1], [0], [0], [1], [0, 0, 1, 1], [], []>} : vector<15x16xbf16>, vector<16x288xbf16>, vector<15x288xf32> -> vector<15x288xf32>
    %c0_13 = arith.constant 0 : index
    %c0_14 = arith.constant 0 : index
    %28 = vector.load %arg5[%c0_13, %c0_14] : memref<15x1xf32, #tpu.memory_space<vmem>>, vector<15x1xf32>
    %29 = vector.broadcast %28 : vector<15x1xf32> to vector<15x288xf32>
    %30 = arith.addf %27, %29 : vector<15x288xf32>
    %31 = vector.shape_cast %30 : vector<15x288xf32> to vector<15x16x18xf32>
    %32 = vector.extract_strided_slice %31 {offsets = [0, 0, 0], sizes = [15, 16, 16], strides = [1, 1, 1]} : vector<15x16x18xf32> to vector<15x16x16xf32>
    %33 = vector.extract_strided_slice %32 {offsets = [0, 0, 0], sizes = [3, 16, 16], strides = [1, 1, 1]} : vector<15x16x16xf32> to vector<3x16x16xf32>
    %c0_15 = arith.constant 0 : index
    %c0_16 = arith.constant 0 : index
    %c0_17 = arith.constant 0 : index
    %c0_18 = arith.constant 0 : index
    %34 = vector.load %arg6[%c0_15, %c0_16, %c0_17, %c0_18] : memref<1x3x16x16xf32, #tpu.memory_space<vmem>>, vector<1x3x16x16xf32>
    %35 = vector.shape_cast %34 : vector<1x3x16x16xf32> to vector<3x16x16xf32>
    %36 = vector.shape_cast %33 : vector<3x16x16xf32> to vector<1x3x16x16xf32>
    tpu.vector_store %arg6[%c0_15, %c0_16, %c0_17, %c0_18], %36 {strides = array<i32>} : memref<1x3x16x16xf32, #tpu.memory_space<vmem>>, vector<1x3x16x16xf32>,
    %37 = vector.extract_strided_slice %32 {offsets = [3, 0, 0], sizes = [12, 16, 16], strides = [1, 1, 1]} : vector<15x16x16xf32> to vector<12x16x16xf32>
    %c0_19 = arith.constant 0 : index
    %c0_20 = arith.constant 0 : index
    %c0_21 = arith.constant 0 : index
    %c0_22 = arith.constant 0 : index
    %38 = vector.load %arg7[%c0_19, %c0_20, %c0_21, %c0_22] : memref<1x12x16x16xf32, #tpu.memory_space<vmem>>, vector<1x12x16x16xf32>
    %39 = vector.shape_cast %38 : vector<1x12x16x16xf32> to vector<12x16x16xf32>
    %40 = vector.shape_cast %37 : vector<12x16x16xf32> to vector<1x12x16x16xf32>
    tpu.vector_store %arg7[%c0_19, %c0_20, %c0_21, %c0_22], %40 {strides = array<i32>} : memref<1x12x16x16xf32, #tpu.memory_space<vmem>>, vector<1x12x16x16xf32>,
    return
  }
  func.func @transform_0(%arg0: i32) -> (i32, i32, i32, i32) {
    %c0_i32 = arith.constant 0 : i32
    %c0_i32_0 = arith.constant 0 : i32
    %c0_i32_1 = arith.constant 0 : i32
    %c0_i32_2 = arith.constant 0 : i32
    return %arg0, %c0_i32, %c0_i32_0, %c0_i32_1 : i32, i32, i32, i32
  }
  func.func @transform_1(%arg0: i32) -> (i32, i32) {
    %c0_i32 = arith.constant 0 : i32
    %c0_i32_0 = arith.constant 0 : i32
    %c0_i32_1 = arith.constant 0 : i32
    return %c0_i32, %c0_i32_0 : i32, i32
  }
  func.func @transform_2(%arg0: i32) -> (i32, i32) {
    %c0_i32 = arith.constant 0 : i32
    %c0_i32_0 = arith.constant 0 : i32
    %c0_i32_1 = arith.constant 0 : i32
    return %c0_i32, %c0_i32_0 : i32, i32
  }
  func.func @transform_3(%arg0: i32) -> (i32, i32) {
    %c0_i32 = arith.constant 0 : i32
    %c0_i32_0 = arith.constant 0 : i32
    %c0_i32_1 = arith.constant 0 : i32
    return %c0_i32, %c0_i32_0 : i32, i32
  }
  func.func @transform_4(%arg0: i32) -> (i32, i32) {
    %c0_i32 = arith.constant 0 : i32
    %c0_i32_0 = arith.constant 0 : i32
    %c0_i32_1 = arith.constant 0 : i32
    return %c0_i32, %c0_i32_0 : i32, i32
  }
  func.func @transform_5(%arg0: i32) -> (i32, i32, i32, i32) {
    %c0_i32 = arith.constant 0 : i32
    %c0_i32_0 = arith.constant 0 : i32
    %c0_i32_1 = arith.constant 0 : i32
    %c0_i32_2 = arith.constant 0 : i32
    return %arg0, %c0_i32, %c0_i32_0, %c0_i32_1 : i32, i32, i32, i32
  }
  func.func @transform_6(%arg0: i32) -> (i32, i32, i32, i32) {
    %c0_i32 = arith.constant 0 : i32
    %c0_i32_0 = arith.constant 0 : i32
    %c0_i32_1 = arith.constant 0 : i32
    %c0_i32_2 = arith.constant 0 : i32
    return %arg0, %c0_i32, %c0_i32_0, %c0_i32_1 : i32, i32, i32, i32
  }
}

</mosaic_0001>

<bundles_post_ra>
// kernel: tpu_custom_call.1
= control target key start
LH: loop header
LB: loop body
LE: loop exit
PB: predicated region body
PF: predicated region fallthrough
CT: control target
= control target key end

     0   :  { %12 = vsyncpa [#allocation3], 0  ;;  %s2977_s0 = inlined_call_operand.hbm [shape: f32[2,16,16,16], index: 0, kind: input, shape index: {}]   ;;  %s2978_s1 = inlined_call_operand.vmem [shape: bf16[16,144], index: 1, kind: input, shape index: {}]   ;;  %s2979_s2 = inlined_call_operand.vmem [shape: f32[16,1], index: 2, kind: input, shape index: {}]   ;;  %s2980_s3 = inlined_call_operand.vmem [shape: bf16[15,16], index: 3, kind: input, shape index: {}]   ;;  %s2981_s4 = inlined_call_operand.vmem [shape: f32[15,1], index: 4, kind: input, shape index: {}]   ;;  %s2982_s5 = inlined_call_operand.hbm [shape: f32[2,3,16,16], index: 5, kind: output, shape index: {0}]   ;;  %s2983_s6 = inlined_call_operand.hbm [shape: f32[2,12,16,16], index: 6, kind: output, shape index: {1}]  }
   0x1   :  { %14 = vsyncpa [#allocation3 + $0x1], 0 }
   0x2   :  { %15 = vsyncpa [#allocation4], 0 }
   0x3   :  { %17 = vsyncpa [#allocation4 + $0x1], 0 }
   0x4   :  { %18 = vsyncpa [#allocation7], 0 }
   0x5   :  { %20 = vsyncpa [#allocation7 + $0x1], 0  ;;  %s2286_s21 = smov 0   ;;  %s2288_s22 = smov 0  }
   0x6   :  { %s2290_s23 = smov 0   ;;  %s2292_s24 = smov 0  }
   0x7 LB: > { %s2307_s25 = sadd.s32 4294967295, %s2203_s24   ;;  %s1941_s26 = sadd.s32 4294967294, %s2203_s24   ;;  %s2203_s24 = sphi %s2292_s24, %s2996_s24   ;;  %s2199_s23 = sphi %s2290_s23, %s2995_s23   ;;  %s2195_s22 = sphi %s2288_s22, %s2994_s22   ;;  %s2191_s21 = sphi %s2286_s21, %s2993_s21  }
   0x8   : > { %s2311_s27 = sadd.s32 1, %s2203_s24   ;;  %s33_s28 = sadd.s32 1, %s2199_s23 }
   0x9   : > { %s30_s29 = ssub.s32 %s2203_s24, %s2311_s27  ;;  %p40_p0 = scmp.ne.s32.totalorder %s2199_s23, %s2195_s22 }
   0xa   : > { %p31_p1 = scmp.eq.s32.totalorder %s30_s29, 0  ;;  %p41_p2 = scmp.eq.s32.totalorder %s2203_s24, 0 }
   0xb   : > { %p46_p3 = scmp.ne.s32.totalorder %s2195_s22, %s2191_s21  ;;  %p47_p4 = scmp.eq.s32.totalorder %s2307_s25, 0 }
   0xc   : > { %s2323_s30 = scalar_select %p31_p1, %s2199_s23, %s33_s28  }
   0xd   : > { %p2325_p5 = por %p41_p2, %p40_p0  ;;  %p2329_p6 = por %p47_p4, %p46_p3 }
   0xe   : > { %p154_p7 = scmp.eq.s32.totalorder %s2307_s25, 1  ;;  %p160_p8 = scmp.eq.s32.totalorder %s1941_s26, 1 }
   0xf   : > { %p1992_p10 = scmp.lt.s32.totalorder %s2203_s24, 2  ;;  %s218_s11 = sand.u32 1, %s2199_s23  }
  0x10   : > { %p2336_p11 = por %p154_p7, %p40_p0  ;;  %p2340_p12 = por %p160_p8, %p46_p3 }
  0x11   : > { %s1962_s12 = sshll.u32 %s2203_s24, 12  ;;  %s1944_s13 = sshll.u32 %s218_s11, 8 }
  0x12   : > { %s2987_s9 = scalar_select %p2336_p11, 1, 0 }
  0x13   : > { %s2988_s10 = scalar_select %p2340_p12, 1, 0 }
  0x14   : > { %s2349_s16 = scalar_lea.hbm %s2977_s0, %s1962_s12  ;;  %s222_s17 = scalar_lea.vmem [#allocation2], %s1944_s13 }
  0x15   : > { %s229_s18 = sshll.u32 %s222_s17, 4  ;;  %p2353_p13 = pnand %p1992_p10, %p2325_p5  ;;  %s2357_s18 = int_to_ptr.vmem [resolvable:$true] %s229_s18 }
  0x16   : > { %s2359_s20 = scalar_lea.sflag [#allocation3], %s218_s11  ;;  %s2075_s26 = scalar_lea.hbm %s2349_s16, 4096 }
  0x17   : > { %p2076_p0 = scmp.ne.s32.totalorder %s2349_s16, %s2075_s26  ;;  %p2077_p1 = pneg %p2353_p13 }
  0x18   : > { %s2080_s7 = scalar_lea.hbm %s2977_s0, 8192  ;;  %p2081_p4 = scmp.lt.u32.totalorder %s2349_s16, %s2977_s0 }
  0x19   : > { %p2078_p2 = pnand %p2077_p1, %p2076_p0  ;;  %p2082_p5 = scmp.lt.u32.totalorder %s2080_s7, %s2075_s26 }
  0x1a   : > { %p2084_p8 = scmp.lt.u32.totalorder %s2075_s26, %s2349_s16 }
  0x1b   : > { %p2079_p3 = pneg %p2078_p2  ;;  %p2083_p7 = por %p2082_p5, %p2081_p4 }
  0x1d   : > { %p2085_p10 = por %p2084_p8, %p2083_p7 }
  0x1f   : > { %p2086_p9 = pnand %p2085_p10, %p2079_p3 }
  0x21   : > { %2089 = shalt.err (!%p2086_p9)
}
  0x22   : > { %s2090_s11 = scalar_lea.vmem %s2357_s18, 4096  ;;  %s2205_s14 = smov [#allocation2]  }
  0x23   : > { %p2091_p0 = scmp.ne.s32.totalorder %s2357_s18, %s2090_s11  ;;  %s2095_s15 = sshll.u32 %s2205_s14, 4  ;;  %s2096_s15 = int_to_ptr.vmem [resolvable:$false] %s2095_s15 }
  0x24   : > { %s2097_s17 = scalar_lea.vmem %s2096_s15, 8192  ;;  %p2098_p11 = scmp.lt.s32.totalorder %s2357_s18, %s2096_s15 }
  0x25   : > { %p2093_p2 = pnand %p2091_p0, %p2077_p1  ;;  %p2099_p4 = scmp.lt.s32.totalorder %s2097_s17, %s2090_s11 }
  0x27   : > { %p2094_p12 = pneg %p2093_p2  ;;  %p2100_p5 = por %p2099_p4, %p2098_p11 }
  0x29   : > { %p2101_p7 = pnand %p2100_p5, %p2094_p12 }
  0x2b   : > { %2104 = shalt.err (!%p2101_p7)
}
  0x2c   : > { %s2206_s26 = smov 128   ;;  %s2207_s28 = smov 8  }
  0x2d   : > { %1984 = dma.hbm_to_vmem [thread:$0]  (!%p2353_p13), %s2349_s16, 4096, %s2357_s18, %s2359_s20, %s2206_s26, %s2206_s26, %s2207_s28  }
  0x2e   : > { %p1947_p9 = scmp.ge.s32.totalorder %s2203_s24, 1  ;;  %p237_p1 = scmp.lt.s32.totalorder %s2203_s24, 3 }
  0x30   : > { %p238_p3 = pnand %p1947_p9, %p237_p1 }
  0x31   : > { %s2390_s29 = sand.u32 (!%p238_p3), 1, %s2195_s22  }
  0x32   : > { %241 = sbr.rel (%p238_p3) target bundleno = 1188 (0x4a4), region = 40  ;;  %s1948_s7 = sshll.u32 (!%p238_p3), %s2390_s29, 8 }
  0x33   : > { %s244_s12 = scalar_lea.sflag (!%p238_p3), [#allocation3], %s2390_s29  ;;  %s2394_s13 = scalar_lea.vmem (!%p238_p3), [#allocation2], %s1948_s7 }
  0x39   : > { %2178 = dma.done.wait (%p2329_p6), %s244_s12, 4096  }
  0x3a   : > { %2180 = vsyncadd (%p2329_p6), %s244_s12, 4294963200  ;;  %v2208_v0 = vmov 1983009808   ;;  %v385_v2 = vlaneseq  ;;  %v2209_v3 = vmov 1934713408   ;;  %v282_v5 = vld [vmem:[%s2394_s13] sm:$0xff] }
  0x3b   : > { %v383_v1 = vunpack.c.l.s4 %v2208_v0  ;;  %v447_v4 = vunpack.c.l.s4 %v2209_v3  ;;  %v283_v6 = vld [vmem:[%s2394_s13 + $0x8] sm:$0xff]  ;;  %v284_v7 = vld [vmem:[%s2394_s13 + $0x10] sm:$0xff]  ;;  %v285_v10 = vld [vmem:[%s2394_s13 + $0x18] sm:$0xff]  ;;  %vm330_vm0 = vcmask 130048   ;;  %s2210_s8 = smov 52   ;;  %s2211_s16 = smov 16  }
  0x3c   : > { %v386_v9 = vshrl.u32 %v385_v2, 7  ;;  %v286_v11 = vld [vmem:[%s2394_s13 + $0x20] sm:$0xff]  ;;  %v287_v12 = vld [vmem:[%s2394_s13 + $0x28] sm:$0xff]  ;;  %v314_v13 = vpack.c.bf16 %v283_v6, %v282_v5  ;;  %v288_v15 = vld [vmem:[%s2394_s13 + $0x30] sm:$0xff]  ;;  %v315_v18 = vpack.c.bf16 %v285_v10, %v284_v7  ;;  %s2212_s18 = smov 88   ;;  %s2213_s19 = smov 36  }
  0x3d   : > { %v384_v8 = vunpack.c.0.s8 %v383_v1  ;;  %v448_v14 = vunpack.c.0.s8 %v447_v4  ;;  %v289_v16 = vld [vmem:[%s2394_s13 + $0x38] sm:$0xff]  ;;  %v290_v17 = vld [vmem:[%s2394_s13 + $0x40] sm:$0xff]  ;;  %v316_v19 = vpack.c.bf16 %v287_v12, %v286_v11  ;;  %v291_v20 = vld [vmem:[%s2394_s13 + $0x48] sm:$0xff]  ;;  %s2214_s20 = smov 18   ;;  %s2215_s11 = smov 72   ;;  %vm730_vm1 = vcmask 146432  }
  0x3e   : > { %v292_v21 = vld [vmem:[%s2394_s13 + $0x50] sm:$0xff]  ;;  %v293_v22 = vld [vmem:[%s2394_s13 + $0x58] sm:$0xff]  ;;  %v317_v23 = vpack.c.bf16 %v289_v16, %v288_v15  ;;  %v294_v24 = vld [vmem:[%s2394_s13 + $0x60] sm:$0xff]  ;;  %v318_v27 = vpack.c.bf16 %v291_v20, %v290_v17  ;;  %v2416_v29 = vsel %vm330_vm0, %v314_v13, 0  ;;  %v2424_v35 = vsel %vm330_vm0, %v315_v18, 0  ;;  %s2216_s14 = smov 34  }
  0x3f   : > { %v295_v25 = vld [vmem:[%s2394_s13 + $0x68] sm:$0xff]  ;;  %v296_v26 = vld [vmem:[%s2394_s13 + $0x70] sm:$0xff]  ;;  %v319_v28 = vpack.c.bf16 %v293_v22, %v292_v21  ;;  %v2418_v30 = vsub.s32 %v384_v8, %v386_v9  ;;  %v297_v31 = vld [vmem:[%s2394_s13 + $0x78] sm:$0xff]  ;;  %v2427_v36 = vsel %vm330_vm0, %v316_v19, 0  ;;  %v2429_v37 = vsub.s32 %v448_v14, %v386_v9  ;;  %s2217_s15 = smov 108   ;;  %s2218_s17 = smov 70  }
  0x40   : > { %v298_v32 = vld [vmem:[%s2394_s13 + $0x80] sm:$0xff]  ;;  %v299_v33 = vld [vmem:[%s2394_s13 + $0x88] sm:$0xff]  ;;  %v320_v34 = vpack.c.bf16 %v295_v25, %v294_v24  ;;  %v300_v38 = vld [vmem:[%s2394_s13 + $0x90] sm:$0xff]  ;;  %v321_v41 = vpack.c.bf16 %v297_v31, %v296_v26  ;;  %v2435_v43 = vsel %vm330_vm0, %v317_v23, 0  ;;  %v2438_v44 = vsel %vm330_vm0, %v318_v27, 0  ;;  %s2219_s26 = smov 126  }
  0x41   : > { %v301_v39 = vld [vmem:[%s2394_s13 + $0x98] sm:$0xff]  ;;  %v302_v40 = vld [vmem:[%s2394_s13 + $0xa0] sm:$0xff]  ;;  %v322_v42 = vpack.c.bf16 %v299_v33, %v298_v32  ;;  %v303_v45 = vld [vmem:[%s2394_s13 + $0xa8] sm:$0xff]  ;;  %v2444_v49 = vsel %vm330_vm0, %v319_v28, 0  ;;  %v381_v51 = vcombine.high %v2416_v29, %v2438_v44  ;;  %v380_v33 = vcombine.low %v2416_v29, %v2438_v44  ;;  %s2220_s28 = smov 106   ;;  %s2221_s7 = smov 54  }
  0x42   : > { %v304_v46 = vld [vmem:[%s2394_s13 + $0xb0] sm:$0xff]  ;;  %v305_v47 = vld [vmem:[%s2394_s13 + $0xb8] sm:$0xff]  ;;  %v323_v48 = vpack.c.bf16 %v301_v39, %v300_v38  ;;  %v351_v50 = vsel %vm330_vm0, %v320_v34, 0  ;;  %v306_v52 = vld [vmem:[%s2394_s13 + $0xc0] sm:$0xff]  ;;  %v324_v55 = vpack.c.bf16 %v303_v45, %v302_v40  ;;  %v2453_v57 = vsel %vm330_vm0, %v321_v41, 0  ;;  %s2222_s12 = smov 124  }
  0x43   : > { %v307_v53 = vld [vmem:[%s2394_s13 + $0xc8] sm:$0xff]  ;;  %v308_v54 = vld [vmem:[%s2394_s13 + $0xd0] sm:$0xff]  ;;  %v325_v56 = vpack.c.bf16 %v305_v47, %v304_v46  ;;  %v516_v58 = vcombine.low %v2424_v35, %v2444_v49  ;;  %v309_v59 = vld [vmem:[%s2394_s13 + $0xd8] sm:$0xff]  ;;  %v357_v63 = vsel %vm330_vm0, %v322_v42, 0  ;;  %v395_v1 = vrot.slane %v381_v51, %v2418_v30  ;;  %p2990_p11 = scmp.ne.s32.totalorder %s2987_s9, 0 }
  0x44   : > { %v310_v60 = vld [vmem:[%s2394_s13 + $0xe0] sm:$0xff]  ;;  %v311_v61 = vld [vmem:[%s2394_s13 + $0xe8] sm:$0xff]  ;;  %v326_v62 = vpack.c.bf16 %v307_v53, %v306_v52  ;;  %v2462_v0 = vsel %vm330_vm0, %v323_v48, 0  ;;  %v312_v2 = vld [vmem:[%s2394_s13 + $0xf0] sm:$0xff]  ;;  %v327_v4 = vpack.c.bf16 %v309_v59, %v308_v54  ;;  %v363_v6 = vsel %vm330_vm0, %v324_v55, 0 }
  0x45   : > { %v313_v3 = vld [vmem:[%s2394_s13 + $0xf8] sm:$0xff]  ;;  %v328_v5 = vpack.c.bf16 %v311_v61, %v310_v60  ;;  %v396_v7 = vcombine.low %v2427_v36, %v351_v50  ;;  %v397_v10 = vcombine.high %v2427_v36, %v351_v50  ;;  %v517_v11 = vcombine.high %v2424_v35, %v2444_v49  ;;  %s2223_s13 = smov 90  }
  0x46   : > { %v329_v8 = vpack.c.bf16 %v313_v3, %v312_v2  ;;  %v369_v9 = vsel %vm330_vm0, %v326_v62, 0  ;;  %v366_v12 = vsel %vm330_vm0, %v325_v56, 0  ;;  %v372_v13 = vsel %vm330_vm0, %v327_v4, 0 }
  0x47   : > { %v375_v14 = vsel %vm330_vm0, %v328_v5, 0  ;;  %v413_v15 = vcombine.high %v357_v63, %v369_v9  ;;  %v411_v17 = vrot.slane %v397_v10, %v2418_v30  ;;  %v412_v18 = vcombine.low %v357_v63, %v369_v9 }
  0x48   : > { %v378_v16 = vsel %vm330_vm0, %v329_v8, 0  ;;  %v429_v19 = vcombine.high %v363_v6, %v375_v14  ;;  %v428_v21 = vcombine.low %v363_v6, %v375_v14  ;;  %v531_v22 = vrot.slane %v517_v11, %v2418_v30 }
  0x49   : > { %v427_v20 = vrot.slane %v413_v15, %v2418_v30  ;;  %v533_v23 = vcombine.high %v2435_v43, %v2453_v57  ;;  %v460_v25 = vcombine.low %v395_v1, %v411_v17  ;;  %v532_v26 = vcombine.low %v2435_v43, %v2453_v57 }
  0x4a   : > { %v443_v24 = vrot.slane %v429_v19, %v2418_v30  ;;  %v549_v27 = vcombine.high %v2462_v0, %v372_v13  ;;  %v548_v31 = vcombine.low %v2462_v0, %v372_v13  ;;  %v565_v32 = vcombine.high %v366_v12, %v378_v16 }
  0x4b   : > { %v547_v28 = vrot.slane %v533_v23, %v2418_v30  ;;  %v468_v34 = vrot.slane %v460_v25, %v2429_v37  ;;  %v461_v39 = vcombine.high %v395_v1, %v411_v17  ;;  %v388_v47 = vrot.slane %v380_v33, %v2418_v30 }
  0x4c   : > { %v492_v36 = vcombine.low %v427_v20, %v443_v24  ;;  %v563_v38 = vrot.slane %v549_v27, %v2418_v30  ;;  %v579_v40 = vrot.slane %v565_v32, %v2418_v30  ;;  %v493_v42 = vcombine.high %v427_v20, %v443_v24 }
  0x4d   : > { %v596_v41 = vcombine.low %v531_v22, %v547_v28  ;;  %v597_v43 = vcombine.high %v531_v22, %v547_v28  ;;  %v2495_v46 = vrot.slane %v461_v39, %v2429_v37  ;;  %v404_v29 = vrot.slane %v396_v7, %v2418_v30 }
  0x4e   : > { %v500_v45 = vrot.slane %v492_v36, %v2429_v37  ;;  %v564_v44 = vcombine.low %v366_v12, %v378_v16  ;;  %v628_v50 = vcombine.low %v563_v38, %v579_v40  ;;  %v2501_v51 = vrot.slane %v493_v42, %v2429_v37 }
  0x4f   : > { %v604_v48 = vrot.slane %v596_v41, %v2429_v37  ;;  %v2506_v53 = vrot.slane %v597_v43, %v2429_v37  ;;  %v629_v54 = vcombine.high %v563_v38, %v579_v40  ;;  %v420_v55 = vrot.slane %v412_v18, %v2418_v30 }
  0x50   : > { %v2503_v52 = vcombine.high %v468_v34, %v500_v45  ;;  %v636_v56 = vrot.slane %v628_v50, %v2429_v37  ;;  %v512_v57 = vcombine.low %v468_v34, %v500_v45  ;;  %v436_v59 = vrot.slane %v428_v21, %v2418_v30 }
  0x51   : > { %v444_v60 = vcombine.low %v388_v47, %v404_v29  ;;  %v2513_v61 = vcombine.low %v2495_v46, %v2501_v51  ;;  %v2516_v62 = vrot.slane %v629_v54, %v2429_v37  ;;  %v524_v63 = vrot.slane %v516_v58, %v2418_v30 }
  0x52   : > { %v649_v0 = vcombine.high %v604_v48, %v636_v56  ;;  %v648_v1 = vcombine.low %v604_v48, %v636_v56  ;;  %v476_v3 = vcombine.low %v420_v55, %v436_v59  ;;  %v540_v5 = vrot.slane %v532_v26, %v2418_v30 }
  0x53   : > { %v452_v2 = vrot.slane %v444_v60, %v2429_v37  ;;  %v2525_v4 = vcombine.low %v2506_v53, %v2516_v62  ;;  %v556_v6 = vrot.slane %v548_v31, %v2418_v30  ;;  %v572_v7 = vrot.slane %v564_v44, %v2418_v30 }
  0x54   : > { %v684_v8 = vpack.i.b16 %v649_v0, %v2503_v52  ;;  %v678_v9 = vpack.i.b16 %v648_v1, %v512_v57  ;;  %v484_v49 = vrot.slane %v476_v3, %v2429_v37  ;;  %v580_v58 = vcombine.low %v524_v63, %v540_v5 }
  0x55   : > { %v690_v35 = vpack.i.b16 %v2525_v4, %v2513_v61  ;;  %v612_v10 = vcombine.low %v556_v6, %v572_v7  ;;  %v445_v11 = vcombine.high %v388_v47, %v404_v29  ;;  %v477_v12 = vcombine.high %v420_v55, %v436_v59 }
  0x56   : > { %718 = vrot.lane.b32.xlu1 %v684_v8, %s2210_s8  ;;  %714 = vrot.lane.b32.xlu0 %v678_v9, %s2211_s16  ;;  %v581_v13 = vcombine.high %v524_v63, %v540_v5  ;;  %v509_v14 = vcombine.high %v452_v2, %v484_v49  ;;  %v588_v15 = vrot.slane %v580_v58, %v2429_v37  ;;  %v679_v25 = vshrl.u32 %v512_v57, 16  ;;  %s2224_s8 = smov 14   ;;  %s2226_s16 = smov 19  }
  0x57   : > { %v620_v16 = vrot.slane %v612_v10, %v2429_v37  ;;  %v613_v17 = vcombine.high %v556_v6, %v572_v7  ;;  %v459_v18 = vrot.slane %v445_v11, %v2429_v37  ;;  %v491_v19 = vrot.slane %v477_v12, %v2429_v37 }
  0x58   : > { %v595_v20 = vrot.slane %v581_v13, %v2429_v37  ;;  %v2539_v21 = vcombine.low %v452_v2, %v484_v49  ;;  %v680_v28 = vshrl.u32 %v648_v1, 16  ;;  %v685_v40 = vshrl.u32 %v2503_v52, 16 }
  0x59   : > { %v645_v22 = vcombine.high %v588_v15, %v620_v16  ;;  %v627_v23 = vrot.slane %v613_v17, %v2429_v37  ;;  %v2542_v24 = vcombine.low %v588_v15, %v620_v16  ;;  %v510_v26 = vcombine.low %v459_v18, %v491_v19 }
  0x5a   : > { %722 = vrot.lane.b32.xlu1 %v690_v35, %s2212_s18  ;;  %v655_v27 = vshrl.u32 %v2539_v21, 16  ;;  %v511_v38 = vcombine.high %v459_v18, %v491_v19  ;;  %v686_v41 = vshrl.u32 %v649_v0, 16  ;;  %v681_v42 = vpack.i.b16 %v680_v28, %v679_v25  ;;  %s2227_s18 = smov 127  }
  0x5b   : > { %v660_v31 = vpack.i.b16 %v645_v22, %v509_v14  ;;  %v646_v32 = vcombine.low %v595_v20, %v627_v23  ;;  %v656_v33 = vshrl.u32 %v2542_v24, 16  ;;  %v647_v39 = vcombine.high %v595_v20, %v627_v23 }
  0x5c   : > { %v654_v43 = vpack.i.b16 %v2542_v24, %v2539_v21  ;;  %v673_v47 = vshrl.u32 %v511_v38, 16  ;;  %v687_v44 = vpack.i.b16 %v686_v41, %v685_v40  ;;  %v691_v48 = vshrl.u32 %v2513_v61, 16  ;;  %v2073_v40 = vld [vmem:[%s2978_s1 + $0x4] ss:$8 sps:$4 sm:$0xff]  }
  0x5d   : > { %702 = vrot.lane.b32.xlu0 %v660_v31, %s2213_s19  ;;  %v666_v34 = vpack.i.b16 %v646_v32, %v510_v26  ;;  %v657_v36 = vpack.i.b16 %v656_v33, %v655_v27  ;;  %v672_v45 = vpack.i.b16 %v647_v39, %v511_v38  ;;  %v674_v29 = vshrl.u32 %v647_v39, 16  ;;  %s2228_s19 = smov 109   ;;  %1954 = vmatprep.mubr.msk.bf16.mxu1 %vm330_vm0, %v2073_v40  ;;  %v897_v41 = vld [vmem:[%s2979_s2 + $0x8] sm:$0xff] }
  0x5e   : > { %v692_v50 = vshrl.u32 %v2525_v4, 16  ;;  %v661_v54 = vshrl.u32 %v509_v14, 16  ;;  %v662_v55 = vshrl.u32 %v645_v22, 16  ;;  %v515_v57 = vcombine.high %v2495_v46, %v2501_v51  ;;  %1953 = vmatprep.mubr.msk.bf16.mxu0 %vm330_vm0, %v2073_v40 }
  0x5f   : > { %700 = vrot.lane.b32.xlu1 %v657_v36, %s2214_s20  ;;  %v675_v52 = vpack.i.b16 %v674_v29, %v673_v47  ;;  %v651_v59 = vcombine.high %v2506_v53, %v2516_v62  ;;  %v667_v61 = vshrl.u32 %v510_v26, 16  ;;  %v668_v63 = vshrl.u32 %v646_v32, 16  ;;  %s2229_s20 = smov 110  }
  0x60   : > { %v693_v56 = vpack.i.b16 %v692_v50, %v691_v48  ;;  %v663_v60 = vpack.i.b16 %v662_v55, %v661_v54  ;;  %v697_v2 = vshrl.u32 %v515_v57, 16  ;;  %vm754_vm2 = vcmask 277504  }
  0x61   : > { %706 = vrot.lane.b32.xlu0 %v666_v34, %s2215_s11  ;;  %v696_v0 = vpack.i.b16 %v651_v59, %v515_v57  ;;  %v669_v1 = vpack.i.b16 %v668_v63, %v667_v61  ;;  %v698_v3 = vshrl.u32 %v651_v59, 16  ;;  %vm757_vm3 = vcmask 424960   ;;  %s2230_s11 = smov 92  }
  0x62   : > { %vm760_vm4 = vcmask 572416   ;;  %vm734_vm5 = vcmask 293888   ;;  %vm737_vm6 = vcmask 441344   ;;  %vm763_vm7 = vcmask 719872  }
  0x63   : > { %716 = vrot.lane.b32.xlu1 %v681_v42, %s2216_s14  ;;  %v699_v46 = vpack.i.b16 %v698_v3, %v697_v2  ;;  %v2225_v12 = vmov 0   ;;  %vm766_vm8 = vcmask 867328   ;;  %vm769_vm9 = vcmask 1014784   ;;  %s2231_s14 = smov 91   ;;  %v896_v42 = vld [vmem:[%s2979_s2] sm:$0xff] }
  0x64   : > { %963 = vmatprep.subr.bf16.mxu1 %v2225_v12  ;;  %2070 = vset.pattern.permute.xlu1 %v2225_v12  ;;  %vm740_vm10 = vcmask 588800   ;;  %vm743_vm11 = vcmask 736256   ;;  %vm746_vm12 = vcmask 883712   ;;  %vm749_vm13 = vcmask 1031168  }
  0x65   : > { %710 = vrot.lane.b32.xlu0 %v672_v45, %s2217_s15  ;;  %vm772_vm14 = vcmask 113664   ;;  %vm784_vm15 = vcmask 154624   ;;  %v1016_v45 = vld [vmem:[%s2981_s4 + $0x8] sm:$0x7f] }
  0x66   : > { %2069 = vset.pattern.permute.xlu0 %v2225_v12 }
  0x67   : > { %720 = vrot.lane.b32.xlu1 %v687_v44, %s2218_s17  ;;  %s2246_s17 = smov 114  }
  0x69   : > { %712 = vrot.lane.b32.xlu0 %v675_v52, %s2219_s26 }
  0x6b   : > { %724 = vrot.lane.b32.xlu1 %v693_v56, %s2220_s28  ;;  %s1971_s28 = smul.u32 48, %s2390_s29 }
  0x6d   : > { %704 = vrot.lane.b32.xlu0 %v663_v60, %s2221_s7  ;;  %s2236_s7 = smov 74  }
  0x6f   : > { %726 = vrot.lane.b32.xlu1 %v696_v0, %s2222_s12  ;;  %s2237_s12 = smov 56  }
  0x71   : > { %708 = vrot.lane.b32.xlu0 %v669_v1, %s2223_s13 }
  0x75   : > { %728 = vrot.lane.b32.xlu0 %v699_v46, %s2224_s8  ;;  %s2238_s8 = smov 38  }
  0xc8   : > { %v719_v51 = vpop.permute.xlu1 %718  ;;  %v715_v53 = vpop.permute.xlu0 %714 }
  0xcc   : > { %v723_v62 = vpop.permute.xlu1 %722 }
  0xcf   : > { %v703_v4 = vpop.permute.xlu0 %702 }
  0xd1   : > { %v701_v5 = vpop.permute.xlu1 %700 }
  0xd2   : > { %v733_v49 = vsel %vm730_vm1, %v654_v43, %v701_v5  ;;  %vm792_vm1 = vcmask 416768   ;;  %v1015_v43 = vld [vmem:[%s2981_s4] sm:$0xff] }
  0xd3   : > { %v707_v6 = vpop.permute.xlu0 %706  ;;  %v736_v16 = vsel %vm734_vm5, %v733_v49, %v703_v4  ;;  %vm840_vm5 = vcmask 891904  }
  0xd5   : > { %v717_v7 = vpop.permute.xlu1 %716 }
  0xd7   : > { %v711_v8 = vpop.permute.xlu0 %710 }
  0xd9   : > { %v721_v9 = vpop.permute.xlu1 %720 }
  0xdb   : > { %v713_v35 = vpop.permute.xlu0 %712 }
  0xdc   : > { %v753_v58 = vsel %vm330_vm0, %v713_v35, %v715_v53 }
  0xdd   : > { %v756_v10 = vsel %vm754_vm2, %v753_v58, %v717_v7  ;;  %v725_v11 = vpop.permute.xlu1 %724  ;;  %vm1951_vm2 = vmneg %vm784_vm15 }
  0xde   : > { %v759_v13 = vsel %vm757_vm3, %v756_v10, %v719_v51  ;;  %vm804_vm3 = vcmask 1039360  }
  0xdf   : > { %v762_v14 = vsel %vm760_vm4, %v759_v13, %v721_v9  ;;  %v705_v15 = vpop.permute.xlu0 %704  ;;  %vm828_vm4 = vcmask 900096  }
  0xe0   : > { %v739_v17 = vsel %vm737_vm6, %v736_v16, %v705_v15  ;;  %v765_v18 = vsel %vm763_vm7, %v762_v14, %v723_v62  ;;  %vm864_vm6 = vcmask 752640   ;;  %vm876_vm7 = vcmask 744448  }
  0xe1   : > { %v768_v19 = vsel %vm766_vm8, %v765_v18, %v725_v11  ;;  %v727_v20 = vpop.permute.xlu1 %726  ;;  %v742_v23 = vsel %vm740_vm10, %v739_v17, %v707_v6  ;;  %v2071_v18 = vld [vmem:[%s2978_s1] ss:$8 sps:$4 sm:$0xff]   ;;  %vm2233_vm8 = vmmov 0   ;;  %vm1218_vm10 = vcmask 31744  }
  0xe2   : > { %v771_v21 = vsel %vm769_vm9, %v768_v19, %v727_v20  ;;  %vm1167_vm9 = vcmask 15360  }
  0xe3   : > { %v709_v22 = vpop.permute.xlu0 %708  ;;  %780 = vrot.lane.b32.xlu1 %v771_v21, %s2226_s16  ;;  %v2232_v21 = vmov 0.0  }
  0xe4   : > { %v745_v24 = vsel %vm743_vm11, %v742_v23, %v709_v22 }
  0xe5   : > { %v748_v25 = vsel %vm746_vm12, %v745_v24, %v711_v8 }
  0xe6   : > { %v751_v26 = vsel %vm749_vm13, %v748_v25, %v713_v35 }
  0xe7   : > { %v729_v27 = vpop.permute.xlu0 %728  ;;  %778 = vrot.lane.b32.xlu1 %v751_v26, %s2226_s16 }
  0xe8   : > { %v774_v28 = vsel %vm772_vm14, %v727_v20, %v729_v27 }
  0xe9   : > { %782 = vrot.lane.b32.xlu0 %v774_v28, %s2226_s16  ;;  %s2241_s16 = smov 94  }
 0x155   : > { %v781_v31 = vpop.permute.xlu1 %780 }
 0x159   : > { %v779_v32 = vpop.permute.xlu1 %778 }
 0x15a   : > { %v785_v33 = vsel %vm784_vm15, %v779_v32, %v781_v31  ;;  %v790_v39 = vsel %vm784_vm15, 0, %v779_v32 }
 0x15b   : > { %v783_v34 = vpop.permute.xlu0 %782  ;;  %812 = vrot.lane.b32.xlu1 %v785_v33, %s2219_s26  ;;  %800 = vrot.lane.b32.xlu0 %v785_v33, %s2227_s18 }
 0x15c   : > { %v786_v36 = vsel %vm784_vm15, %v781_v31, %v783_v34  ;;  %920 = vmatprep.subr.bf16.mxu0 %v785_v33 }
 0x15d   : > { %v794_v38 = vsel %vm792_vm1, %v786_v36, 0  ;;  %1952 = vmatpush1.bf16.msk.msra.mxu0 %vm1951_vm2, %v779_v32 }
 0x15e   : > { %964 = vmatpush1.bf16.msra.mxu1 %v794_v38 }
 0x15f   : > { %810 = vrot.lane.b32.xlu1 %v790_v39, %s2219_s26  ;;  %798 = vrot.lane.b32.xlu0 %v790_v39, %s2227_s18 }
 0x160   : > { %965 = vmatprep.subr.bf16.mxu1 %v2225_v12 }
 0x163   : > { %836 = vrot.lane.b32.xlu1 %v785_v33, %s2228_s19  ;;  %824 = vrot.lane.b32.xlu0 %v785_v33, %s2229_s20 }
 0x167   : > { %802 = vrot.lane.b32.xlu1 %v794_v38, %s2227_s18  ;;  %822 = vrot.lane.b32.xlu0 %v790_v39, %s2229_s20  ;;  %s2242_s18 = smov 76  }
 0x16b   : > { %834 = vrot.lane.b32.xlu1 %v790_v39, %s2228_s19  ;;  %848 = vrot.lane.b32.xlu0 %v785_v33, %s2217_s15 }
 0x16f   : > { %826 = vrot.lane.b32.xlu1 %v794_v38, %s2229_s20  ;;  %814 = vrot.lane.b32.xlu0 %v794_v38, %s2219_s26  ;;  %s2235_s26 = smov 2  }
 0x173   : > { %860 = vrot.lane.b32.xlu1 %v785_v33, %s2230_s11  ;;  %846 = vrot.lane.b32.xlu0 %v790_v39, %s2217_s15 }
 0x177   : > { %850 = vrot.lane.b32.xlu1 %v794_v38, %s2217_s15  ;;  %838 = vrot.lane.b32.xlu0 %v794_v38, %s2228_s19  ;;  %s2234_s15 = smov 4   ;;  %s2243_s19 = smov 58  }
 0x17b   : > { %858 = vrot.lane.b32.xlu1 %v790_v39, %s2230_s11  ;;  %872 = vrot.lane.b32.xlu0 %v785_v33, %s2231_s14 }
 0x17f   : > { %874 = vrot.lane.b32.xlu1 %v794_v38, %s2231_s14  ;;  %862 = vrot.lane.b32.xlu0 %v794_v38, %s2230_s11 }
 0x183   : > { %884 = vrot.lane.b32.xlu1 %v785_v33, %s2223_s13  ;;  %870 = vrot.lane.b32.xlu0 %v790_v39, %s2231_s14  ;;  %s2245_s14 = smov 22  }
 0x187   : > { %882 = vrot.lane.b32.xlu1 %v790_v39, %s2223_s13  ;;  %886 = vrot.lane.b32.xlu0 %v794_v38, %s2223_s13  ;;  %s2244_s13 = smov 40  }
 0x18b   : > { %905 = vperm.xlu1 %2070, %v897_v41   ;;  %900 = vperm.xlu0 %2069, %v896_v42  }
 0x18f   : > { %1019 = vperm.xlu1 %2070, %v1015_v43   ;;  %1024 = vperm.xlu0 %2069, %v1016_v45  }
 0x1cd   : > { %v813_v47 = vpop.permute.xlu1 %812  ;;  %v801_v29 = vpop.permute.xlu0 %800 }
 0x1d1   : > { %v811_v44 = vpop.permute.xlu1 %810  ;;  %v799_v48 = vpop.permute.xlu0 %798 }
 0x1d2   : > { %v805_v57 = vsel %vm804_vm3, %v799_v48, %v801_v29  ;;  %v817_v1 = vsel %vm749_vm13, %v811_v44, %v813_v47  ;;  %v2074_v48 = vld [vmem:[%s2980_s3] sm:$0xff]  }
 0x1d5   : > { %v837_v50 = vpop.permute.xlu1 %836  ;;  %v825_v52 = vpop.permute.xlu0 %824 }
 0x1d9   : > { %v803_v54 = vpop.permute.xlu1 %802  ;;  %v823_v55 = vpop.permute.xlu0 %822 }
 0x1da   : > { %966 = vmatpush1.bf16.msra.mxu1 %v803_v54  ;;  %v806_v56 = vsel %vm804_vm3, %v801_v29, %v803_v54  ;;  %v829_v51 = vsel %vm828_vm4, %v823_v55, %v825_v52 }
 0x1db   : > { %922 = vmatprep.subr.bf16.mxu0 %v806_v56  ;;  %967 = vmatprep.subr.bf16.mxu1 %v2225_v12 }
 0x1dc   : > { %923 = vmatpush1.bf16.msra.mxu0 %v805_v57 }
 0x1dd   : > { %v835_v59 = vpop.permute.xlu1 %834  ;;  %v849_v60 = vpop.permute.xlu0 %848 }
 0x1de   : > { %v841_v5 = vsel %vm840_vm5, %v835_v59, %v837_v50 }
 0x1e1   : > { %v827_v61 = vpop.permute.xlu1 %826  ;;  %v815_v63 = vpop.permute.xlu0 %814 }
 0x1e2   : > { %968 = vmatpush1.bf16.msra.mxu1 %v815_v63  ;;  %v818_v0 = vsel %vm749_vm13, %v813_v47, %v815_v63  ;;  %v830_v2 = vsel %vm828_vm4, %v825_v52, %v827_v61 }
 0x1e3   : > { %924 = vmatprep.subr.bf16.mxu0 %v818_v0  ;;  %969 = vmatprep.subr.bf16.mxu1 %v2225_v12 }
 0x1e4   : > { %925 = vmatpush1.bf16.msra.mxu0 %v817_v1 }
 0x1e5   : > { %v861_v3 = vpop.permute.xlu1 %860  ;;  %v847_v46 = vpop.permute.xlu0 %846  ;;  %926 = vmatprep.subr.bf16.mxu0 %v830_v2 }
 0x1e6   : > { %970 = vmatpush1.bf16.msra.mxu1 %v827_v61  ;;  %v853_v9 = vsel %vm746_vm12, %v847_v46, %v849_v60 }
 0x1e7   : > { %971 = vmatprep.subr.bf16.mxu1 %v2225_v12 }
 0x1e8   : > { %927 = vmatpush1.bf16.msra.mxu0 %v829_v51 }
 0x1e9   : > { %v851_v53 = vpop.permute.xlu1 %850  ;;  %v839_v62 = vpop.permute.xlu0 %838 }
 0x1ea   : > { %972 = vmatpush1.bf16.msra.mxu1 %v839_v62  ;;  %v842_v4 = vsel %vm840_vm5, %v837_v50, %v839_v62  ;;  %v854_v6 = vsel %vm746_vm12, %v849_v60, %v851_v53 }
 0x1eb   : > { %928 = vmatprep.subr.bf16.mxu0 %v842_v4  ;;  %973 = vmatprep.subr.bf16.mxu1 %v2225_v12 }
 0x1ec   : > { %929 = vmatpush1.bf16.msra.mxu0 %v841_v5 }
 0x1ed   : > { %v859_v7 = vpop.permute.xlu1 %858  ;;  %v873_v8 = vpop.permute.xlu0 %872  ;;  %930 = vmatprep.subr.bf16.mxu0 %v854_v6 }
 0x1ee   : > { %974 = vmatpush1.bf16.msra.mxu1 %v851_v53  ;;  %v865_v10 = vsel %vm864_vm6, %v859_v7, %v861_v3 }
 0x1ef   : > { %975 = vmatprep.subr.bf16.mxu1 %v2225_v12 }
 0x1f0   : > { %931 = vmatpush1.bf16.msra.mxu0 %v853_v9 }
 0x1f1   : > { %v875_v35 = vpop.permute.xlu1 %874  ;;  %v863_v49 = vpop.permute.xlu0 %862 }
 0x1f2   : > { %976 = vmatpush1.bf16.msra.mxu1 %v863_v49  ;;  %v866_v58 = vsel %vm864_vm6, %v861_v3, %v863_v49  ;;  %v878_v11 = vsel %vm876_vm7, %v873_v8, %v875_v35 }
 0x1f3   : > { %932 = vmatprep.subr.bf16.mxu0 %v866_v58  ;;  %977 = vmatprep.subr.bf16.mxu1 %v2225_v12 }
 0x1f4   : > { %933 = vmatpush1.bf16.msra.mxu0 %v865_v10 }
 0x1f5   : > { %v885_v13 = vpop.permute.xlu1 %884  ;;  %v871_v14 = vpop.permute.xlu0 %870  ;;  %934 = vmatprep.subr.bf16.mxu0 %v878_v11 }
 0x1f6   : > { %978 = vmatpush1.bf16.msra.mxu1 %v875_v35  ;;  %v877_v15 = vsel %vm876_vm7, %v871_v14, %v873_v8 }
 0x1f7   : > { %979 = vmatprep.subr.bf16.mxu1 %v2225_v12 }
 0x1f8   : > { %935 = vmatpush1.bf16.msra.mxu0 %v877_v15 }
 0x1f9   : > { %v883_v16 = vpop.permute.xlu1 %882  ;;  %v887_v17 = vpop.permute.xlu0 %886 }
 0x1fa   : > { %980 = vmatpush1.bf16.msra.mxu1 %v887_v17  ;;  %v890_v19 = vsel %vm743_vm11, %v885_v13, %v887_v17  ;;  %v889_v20 = vsel %vm743_vm11, %v883_v16, %v885_v13 }
 0x1fb   : > { %936 = vmatprep.subr.bf16.mxu0 %v890_v19  ;;  %1965 = vmatprep.subr.bf16.mxu1 %v2232_v21 }
 0x1fc   : > { %937 = vmatpush1.bf16.msra.mxu0 %v889_v20 }
 0x1fd   : > { %996 = vmatmul.mubr.bf16.vlgmr.msra.gmra.mrb[0].mxu1 %v2071_v18 }
 0x1fe   : > { %1967 = vmatprep.mubr.msk.bf16.mxu1 %vm2233_vm8, %v2232_v21 }
 0x1ff   : > { %953 = vmatmul.mubr.bf16.vlgmr.msra.gmra.mrb[0].mxu0 %v2071_v18 }
 0x200   : > { %1067 = vmatprep.mubr.bf16.mxu0 %v2225_v12 }
 0x20a   : > { %v901_v22 = vpop.permute.xlu0 %900  ;;  %v906_v24 = vpop.permute.xlu1 %905 }
 0x20e   : > { %v1020_v54 = vpop.permute.xlu1 %1019  ;;  %v1025_v61 = vpop.permute.xlu0 %1024 }
 0x2d0   : > { %v997_v23 = vpop.f32.mrb[0].mxu1 }
 0x2d1   : > { %v999_v25 = vpop.f32.mrb[1].mxu1  ;;  %v998_v26 = vadd.f32 %v997_v23, %v901_v22 }
 0x2d2   : > { %v954_v27 = vpop.f32.mrb[0].mxu0  ;;  %v1000_v28 = vpop.f32.mrb[2].mxu1 }
 0x2d3   : > { %v1006_v31 = vmax.f32 %v998_v26, 0.0  ;;  %v955_v32 = vadd.f32 %v954_v27, %v901_v22  ;;  %v1001_v33 = vadd.f32 %v1000_v28, %v906_v24  ;;  %v956_v34 = vpop.f32.mrb[1].mxu0  ;;  %v1002_v36 = vpop.f32.mrb[3].mxu1 }
 0x2d4   : > { %v957_v38 = vadd.f32 %v956_v34, %v901_v22  ;;  %v958_v39 = vpop.f32.mrb[2].mxu0 }
 0x2d5   : > { %v1009_v40 = vmax.f32 %v1001_v33, 0.0  ;;  %v959_v12 = vadd.f32 %v958_v39, %v906_v24  ;;  %v960_v41 = vpop.f32.mrb[3].mxu0  ;;  %v1004_v43 = vmax.f32 %v955_v32, 0.0 }
 0x2d6   : > { %v961_v42 = vadd.f32 %v960_v41, %v906_v24  ;;  %v1005_v29 = vmax.f32 %v957_v38, 0.0 }
 0x2d7   : > { %v1014_v45 = vpack.c.bf16 %v1009_v40, %v1006_v31  ;;  %v1007_v47 = vmax.f32 %v959_v12, 0.0 }
 0x2d8   : > { %v1008_v44 = vmax.f32 %v961_v42, 0.0 }
 0x2d9   : > { %v1012_v50 = vpack.c.bf16 %v1007_v47, %v1004_v43  ;;  %1966 = vmatpush3.bf16.msra.mxu1 %v1014_v45 }
 0x2da   : > { %v1013_v52 = vpack.c.bf16 %v1008_v44, %v1005_v29 }
 0x2dc   : > { %1035 = vmatprep.subr.bf16.mxu0 %v1013_v52  ;;  %1968 = vmatmul.mubr.msk.bf16.vlgmr.msra.gmra.mrb[4].mxu1 %vm330_vm0, %v2074_v48 }
 0x2dd   : > { %1036 = vmatpush1.bf16.msra.mxu0 %v1012_v50 }
 0x2e0   : > { %1956 = vmatmul.mubr.msk.bf16.vlgmr.msra.gmra.mrb[4].mxu0 %vm330_vm0, %v2074_v48 }
 0x3af   : > { %v1112_v55 = vpop.f32.mrb[4].mxu1 }
 0x3b0   : > { %v1113_v56 = vadd.f32 %v1112_v55, %v1020_v54  ;;  %v1969_v57 = vpop.f32.mrb[5].mxu1 }
 0x3b1   : > { %v1115_v59 = vpop.f32.mrb[6].mxu1 }
 0x3b2   : > { %1212 = vrot.lane.b32.xlu0 %v1113_v56, %s2234_s15  ;;  %v1970_v60 = vpop.f32.mrb[7].mxu1  ;;  %v1116_v0 = vadd.f32 %v1115_v59, %v1025_v61 }
 0x3b3   : > { %v1069_v63 = vpop.f32.mrb[4].mxu0 }
 0x3b4   : > { %v2621_v1 = vadd.f32 %v1069_v63, %v1020_v54  ;;  %v1071_v2 = vpop.f32.mrb[5].mxu0 }
 0x3b5   : > { %v1073_v3 = vpop.f32.mrb[6].mxu0  ;;  %v1072_v51 = vadd.f32 %v1071_v2, %v1020_v54 }
 0x3b6   : > { %1216 = vrot.lane.b32.xlu0 %v1116_v0, %s2234_s15  ;;  %v1075_v46 = vpop.f32.mrb[7].mxu0  ;;  %1159 = vrot.lane.b32.xlu1 %v2621_v1, %s2235_s26  ;;  %v2629_v53 = vadd.f32 %v1073_v3, %v1025_v61 }
 0x3b7   : > { %v1076_v62 = vadd.f32 %v1075_v46, %v1025_v61 }
 0x3ba   : > { %1161 = vrot.lane.b32.xlu0 %v1072_v51, %s2235_s26  ;;  %1121 = vrot.lane.b32.xlu1 %v2621_v1, %s2229_s20 }
 0x3be   : > { %1123 = vrot.lane.b32.xlu0 %v2629_v53, %s2229_s20  ;;  %1127 = vrot.lane.b32.xlu1 %v2621_v1, %s2230_s11  ;;  %s2239_s20 = smov 20  }
 0x3c2   : > { %1129 = vrot.lane.b32.xlu0 %v2629_v53, %s2230_s11  ;;  %1133 = vrot.lane.b32.xlu1 %v2621_v1, %s2236_s7  ;;  %s2240_s11 = smov 112  }
 0x3c6   : > { %1135 = vrot.lane.b32.xlu0 %v2629_v53, %s2236_s7  ;;  %1139 = vrot.lane.b32.xlu1 %v2621_v1, %s2237_s12 }
 0x3ca   : > { %1141 = vrot.lane.b32.xlu0 %v2629_v53, %s2237_s12  ;;  %1145 = vrot.lane.b32.xlu1 %v2621_v1, %s2238_s8  ;;  %s1973_s12 = smul.u32 768, %s2307_s25 }
 0x3ce   : > { %1147 = vrot.lane.b32.xlu0 %v2629_v53, %s2238_s8  ;;  %1151 = vrot.lane.b32.xlu1 %v2621_v1, %s2239_s20 }
 0x3d2   : > { %1153 = vrot.lane.b32.xlu0 %v2629_v53, %s2239_s20  ;;  %1210 = vrot.lane.b32.xlu1 %v1072_v51, %s2234_s15  ;;  %s1974_s20 = smul.u32 3072, %s2307_s25  ;;  %s2247_s25 = smov [#allocation5]  }
 0x3d6   : > { %1165 = vrot.lane.b32.xlu0 %v1076_v62, %s2235_s26  ;;  %1172 = vrot.lane.b32.xlu1 %v1072_v51, %s2240_s11 }
 0x3da   : > { %1174 = vrot.lane.b32.xlu0 %v1076_v62, %s2240_s11  ;;  %1178 = vrot.lane.b32.xlu1 %v1072_v51, %s2241_s16 }
 0x3de   : > { %1180 = vrot.lane.b32.xlu0 %v1076_v62, %s2241_s16  ;;  %1184 = vrot.lane.b32.xlu1 %v1072_v51, %s2242_s18 }
 0x3e2   : > { %1186 = vrot.lane.b32.xlu0 %v1076_v62, %s2242_s18  ;;  %1190 = vrot.lane.b32.xlu1 %v1072_v51, %s2243_s19  ;;  %s2851_s18 = scalar_lea.hbm %s2982_s5, %s1973_s12 }
 0x3e6   : > { %1192 = vrot.lane.b32.xlu0 %v1076_v62, %s2243_s19  ;;  %1196 = vrot.lane.b32.xlu1 %v1072_v51, %s2244_s13 }
 0x3ea   : > { %1198 = vrot.lane.b32.xlu0 %v1076_v62, %s2244_s13  ;;  %1202 = vrot.lane.b32.xlu1 %v1072_v51, %s2245_s14 }
 0x3ee   : > { %1204 = vrot.lane.b32.xlu0 %v1076_v62, %s2245_s14  ;;  %1163 = vrot.lane.b32.xlu1 %v2629_v53, %s2235_s26  ;;  %s2691_s26 = scalar_lea.vmem [#allocation5], %s1971_s28  ;;  %s1802_s28 = scalar_lea.sflag [#allocation4], %s2390_s29 }
 0x3ef   : > { %s1820_s8 = sshll.u32 %s2691_s26, 4  ;;  %s2870_s8 = int_to_ptr.vmem [resolvable:$true] %s1820_s8 }
 0x3f2   : > { %1225 = vrot.lane.b32.xlu0 %v1116_v0, %s2246_s17  ;;  %1214 = vrot.lane.b32.xlu1 %v1076_v62, %s2234_s15  ;;  %s1972_s15 = smul.u32 192, %s2390_s29 }
 0x3f4   : > { %s2699_s7 = scalar_lea.vmem [#allocation6], %s1972_s15  ;;  %s2105_s15 = scalar_lea.vmem %s2870_s8, 768 }
 0x3f5   : > { %s1836_s19 = sshll.u32 %s2699_s7, 4  ;;  %p2106_p6 = scmp.ne.s32.totalorder %s2870_s8, %s2105_s15  ;;  %s2893_s19 = int_to_ptr.vmem [resolvable:$true] %s1836_s19 }
 0x3f6   : > { %1223 = vrot.lane.b32.xlu1 %v1113_v56, %s2246_s17  ;;  %s2891_s17 = scalar_lea.hbm %s2983_s6, %s1974_s20 }
 0x3f7   : > { %p2107_p12 = pnand %p2106_p6, %p2990_p11 }
 0x3f9   : > { %p2108_p13 = pneg %p2107_p12 }
 0x424   : > { %v2650_v4 = vpop.permute.xlu0 %1212 }
 0x428   : > { %v2652_v5 = vpop.permute.xlu0 %1216  ;;  %v1160_v6 = vpop.permute.xlu1 %1159 }
 0x42c   : > { %v1162_v7 = vpop.permute.xlu0 %1161  ;;  %v1122_v8 = vpop.permute.xlu1 %1121 }
 0x42d   : > { %v1168_v18 = vsel %vm1167_vm9, %v1160_v6, %v1162_v7 }
 0x430   : > { %v2654_v9 = vpop.permute.xlu0 %1123  ;;  %v1128_v35 = vpop.permute.xlu1 %1127 }
 0x431   : > { %v1229_v14 = vcombine.low %v2621_v1, %v1128_v35  ;;  %v1230_v19 = vcombine.high %v2621_v1, %v1128_v35 }
 0x433   : > { %v1237_v23 = vrot.slane %v1229_v14, %v2418_v30  ;;  %v1244_v31 = vrot.slane %v1230_v19, %v2418_v30 }
 0x434   : > { %v2656_v49 = vpop.permute.xlu0 %1129  ;;  %v1134_v58 = vpop.permute.xlu1 %1133 }
 0x435   : > { %v1245_v13 = vcombine.low %v1122_v8, %v1134_v58  ;;  %v1246_v15 = vcombine.high %v1122_v8, %v1134_v58  ;;  %v1501_v58 = vcombine.low %v2629_v53, %v2656_v49 }
 0x437   : > { %v1253_v20 = vrot.slane %v1245_v13, %v2418_v30  ;;  %v1260_v24 = vrot.slane %v1246_v15, %v2418_v30  ;;  %v1502_v13 = vcombine.high %v2629_v53, %v2656_v49 }
 0x438   : > { %v2658_v10 = vpop.permute.xlu0 %1135  ;;  %v1140_v11 = vpop.permute.xlu1 %1139 }
 0x439   : > { %v1293_v32 = vcombine.low %v1237_v23, %v1253_v20  ;;  %v1294_v33 = vcombine.high %v1237_v23, %v1253_v20  ;;  %v1309_v40 = vcombine.low %v1244_v31, %v1260_v24  ;;  %v1310_v12 = vcombine.high %v1244_v31, %v1260_v24 }
 0x43a   : > { %v1517_v7 = vcombine.low %v2654_v9, %v2658_v10 }
 0x43b   : > { %v1301_v44 = vrot.slane %v1293_v32, %v2429_v37  ;;  %v1308_v48 = vrot.slane %v1294_v33, %v2429_v37  ;;  %v1317_v56 = vrot.slane %v1309_v40, %v2429_v37  ;;  %v1324_v57 = vrot.slane %v1310_v12, %v2429_v37 }
 0x43c   : > { %v2661_v16 = vpop.permute.xlu0 %1141  ;;  %v1146_v17 = vpop.permute.xlu1 %1145  ;;  %v1525_v14 = vrot.slane %v1517_v7, %v2418_v30 }
 0x43d   : > { %v1277_v21 = vcombine.low %v1146_v17, %v1168_v18  ;;  %v1278_v22 = vcombine.high %v1146_v17, %v1168_v18  ;;  %v1509_v18 = vrot.slane %v1501_v58, %v2418_v30 }
 0x43f   : > { %v1285_v34 = vrot.slane %v1277_v21, %v2418_v30  ;;  %v1292_v36 = vrot.slane %v1278_v22, %v2418_v30  ;;  %v1516_v21 = vrot.slane %v1502_v13, %v2418_v30  ;;  %v1565_v22 = vcombine.low %v1509_v18, %v1525_v14 }
 0x440   : > { %v2668_v25 = vpop.permute.xlu0 %1147  ;;  %v1152_v26 = vpop.permute.xlu1 %1151 }
 0x441   : > { %v1261_v27 = vcombine.low %v1140_v11, %v1152_v26  ;;  %v1262_v28 = vcombine.high %v1140_v11, %v1152_v26  ;;  %v1518_v11 = vcombine.high %v2654_v9, %v2658_v10  ;;  %v2725_v32 = vrot.slane %v1565_v22, %v2429_v37 }
 0x443   : > { %v1269_v38 = vrot.slane %v1261_v27, %v2418_v30  ;;  %v1276_v39 = vrot.slane %v1262_v28, %v2418_v30  ;;  %v1532_v19 = vrot.slane %v1518_v11, %v2418_v30  ;;  %v1566_v27 = vcombine.high %v1509_v18, %v1525_v14 }
 0x444   : > { %v2677_v41 = vpop.permute.xlu0 %1153  ;;  %v2679_v42 = vpop.permute.xlu1 %1210 }
 0x445   : > { %v1325_v43 = vcombine.low %v1269_v38, %v1285_v34  ;;  %v1326_v45 = vcombine.high %v1269_v38, %v1285_v34  ;;  %v1341_v47 = vcombine.low %v1276_v39, %v1292_v36  ;;  %v1342_v29 = vcombine.high %v1276_v39, %v1292_v36 }
 0x446   : > { %v1581_v9 = vcombine.low %v1516_v21, %v1532_v19  ;;  %v1582_v33 = vcombine.high %v1516_v21, %v1532_v19  ;;  %v1533_v36 = vcombine.low %v2661_v16, %v2677_v41  ;;  %v1534_v38 = vcombine.high %v2661_v16, %v2677_v41 }
 0x447   : > { %v1333_v50 = vrot.slane %v1325_v43, %v2429_v37  ;;  %v1340_v52 = vrot.slane %v1326_v45, %v2429_v37  ;;  %v1349_v54 = vrot.slane %v1341_v47, %v2429_v37  ;;  %v1356_v55 = vrot.slane %v1342_v29, %v2429_v37 }
 0x448   : > { %v2689_v59 = vpop.permute.xlu0 %1165  ;;  %v1173_v60 = vpop.permute.xlu1 %1172  ;;  %v2736_v45 = vrot.slane %v1566_v27, %v2429_v37  ;;  %v2739_v47 = vrot.slane %v1581_v9, %v2429_v37  ;;  %v1219_v16 = vsel %vm1218_vm10, %v2679_v42, %v2650_v4 }
 0x449   : > { %v1357_v61 = vcombine.low %v1301_v44, %v1333_v50  ;;  %v1358_v63 = vcombine.high %v1301_v44, %v1333_v50  ;;  %v1359_v0 = vcombine.low %v1308_v48, %v1340_v52  ;;  %v1360_v1 = vcombine.high %v1308_v48, %v1340_v52 }
 0x44a   : > { %v1361_v2 = vcombine.low %v1317_v56, %v1349_v54  ;;  %v1362_v3 = vcombine.high %v1317_v56, %v1349_v54  ;;  %v1363_v46 = vcombine.low %v1324_v57, %v1356_v55  ;;  %v1364_v51 = vcombine.high %v1324_v57, %v1356_v55 }
 0x44b   : > { %1771 = vst.msk [vmem:[%s2691_s26] sm:$0xff] %vm330_vm0, %v1357_v61  ;;  %1773 = vst.msk [vmem:[%s2691_s26 + $0x10] sm:$0xff] %vm330_vm0, %v1358_v63  ;;  %v2755_v57 = vrot.slane %v1582_v33, %v2429_v37  ;;  %v1548_v61 = vrot.slane %v1534_v38, %v2418_v30 }
 0x44c   : > { %1775 = vst.msk [vmem:[%s2691_s26 + $0x20] sm:$0xff] %vm330_vm0, %v1359_v0  ;;  %1777 = vst.msk [vmem:[%s2699_s7] sm:$0xff] %vm330_vm0, %v1360_v1  ;;  %v1175_v62 = vpop.permute.xlu0 %1174  ;;  %v1179_v6 = vpop.permute.xlu1 %1178 }
 0x44d   : > { %1779 = vst.msk [vmem:[%s2699_s7 + $0x10] sm:$0xff] %vm330_vm0, %v1361_v2  ;;  %1781 = vst.msk [vmem:[%s2699_s7 + $0x20] sm:$0xff] %vm330_vm0, %v1362_v3 }
 0x44e   : > { %1783 = vst.msk [vmem:[%s2699_s7 + $0x30] sm:$0xff] %vm330_vm0, %v1363_v46  ;;  %1785 = vst.msk [vmem:[%s2699_s7 + $0x40] sm:$0xff] %vm330_vm0, %v1364_v51 }
 0x450   : > { %v1181_v8 = vpop.permute.xlu0 %1180  ;;  %v1185_v35 = vpop.permute.xlu1 %1184 }
 0x451   : > { %v1365_v23 = vcombine.low %v1173_v60, %v1185_v35  ;;  %v1366_v28 = vcombine.high %v1173_v60, %v1185_v35  ;;  %v1541_v60 = vrot.slane %v1533_v36, %v2418_v30 }
 0x453   : > { %v1373_v39 = vrot.slane %v1365_v23, %v2418_v30  ;;  %v2748_v41 = vrot.slane %v1366_v28, %v2418_v30 }
 0x454   : > { %v1187_v15 = vpop.permute.xlu0 %1186  ;;  %v1191_v17 = vpop.permute.xlu1 %1190 }
 0x455   : > { %v1381_v20 = vcombine.low %v1179_v6, %v1191_v17  ;;  %v1382_v10 = vcombine.high %v1179_v6, %v1191_v17  ;;  %v1636_v53 = vcombine.low %v1175_v62, %v1187_v15  ;;  %v1637_v29 = vcombine.high %v1175_v62, %v1187_v15 }
 0x457   : > { %v1389_v49 = vrot.slane %v1381_v20, %v2418_v30  ;;  %v2742_v44 = vrot.slane %v1382_v10, %v2418_v30  ;;  %v1644_v48 = vrot.slane %v1636_v53, %v2418_v30  ;;  %v1651_v0 = vrot.slane %v1637_v29, %v2418_v30 }
 0x458   : > { %v1193_v24 = vpop.permute.xlu0 %1192  ;;  %v1197_v26 = vpop.permute.xlu1 %1196 }
 0x459   : > { %v1652_v31 = vcombine.low %v1181_v8, %v1193_v24  ;;  %v1653_v34 = vcombine.high %v1181_v8, %v1193_v24  ;;  %v1429_v50 = vcombine.low %v1373_v39, %v1389_v49  ;;  %v1430_v52 = vcombine.high %v1373_v39, %v1389_v49 }
 0x45a   : > { %v1397_v55 = vcombine.low %v1197_v26, %v1219_v16  ;;  %v1398_v56 = vcombine.high %v1197_v26, %v1219_v16  ;;  %v1445_v1 = vcombine.low %v2748_v41, %v2742_v44  ;;  %v1446_v51 = vcombine.high %v2748_v41, %v2742_v44 }
 0x45b   : > { %v1660_v40 = vrot.slane %v1652_v31, %v2418_v30  ;;  %v2752_v54 = vrot.slane %v1653_v34, %v2418_v30  ;;  %v2765_v46 = vrot.slane %v1429_v50, %v2429_v37  ;;  %v2772_v7 = vrot.slane %v1430_v52, %v2429_v37 }
 0x45c   : > { %v1199_v12 = vpop.permute.xlu0 %1198  ;;  %v2733_v43 = vpop.permute.xlu1 %1202  ;;  %v2776_v35 = vrot.slane %v1397_v55, %v2418_v30 }
 0x45d   : > { %v1700_v4 = vcombine.low %v1644_v48, %v1660_v40  ;;  %v1701_v2 = vcombine.high %v1644_v48, %v1660_v40  ;;  %v1716_v8 = vcombine.low %v1651_v0, %v2752_v54  ;;  %v1717_v11 = vcombine.high %v1651_v0, %v2752_v54 }
 0x45f   : > { %v2782_v58 = vrot.slane %v1700_v4, %v2429_v37  ;;  %v2788_v17 = vrot.slane %v1701_v2, %v2429_v37  ;;  %v1724_v55 = vrot.slane %v1716_v8, %v2429_v37 }
 0x460   : > { %v1205_v42 = vpop.permute.xlu0 %1204  ;;  %v1164_v63 = vpop.permute.xlu1 %1163 }
 0x461   : > { %v1169_v3 = vsel %vm1167_vm9, %v1164_v63, %v2689_v59  ;;  %v2779_v59 = vrot.slane %v1398_v56, %v2418_v30 }
 0x462   : > { %v1549_v62 = vcombine.low %v2668_v25, %v1169_v3  ;;  %v1550_v6 = vcombine.high %v2668_v25, %v1169_v3 }
 0x464   : > { %v1557_v13 = vrot.slane %v1549_v62, %v2418_v30  ;;  %v1564_v25 = vrot.slane %v1550_v6, %v2418_v30  ;;  %v1226_v14 = vpop.permute.xlu0 %1225  ;;  %v1215_v15 = vpop.permute.xlu1 %1214 }
 0x465   : > { %v1684_v18 = vcombine.low %v1205_v42, %v1226_v14  ;;  %v1685_v19 = vcombine.high %v1205_v42, %v1226_v14  ;;  %v1220_v20 = vsel %vm1218_vm10, %v1215_v15, %v2652_v5  ;;  %v1460_v14 = vrot.slane %v1446_v51, %v2429_v37 }
 0x466   : > { %v1597_v21 = vcombine.low %v1541_v60, %v1557_v13  ;;  %v1598_v22 = vcombine.high %v1541_v60, %v1557_v13  ;;  %v1613_v23 = vcombine.low %v1548_v61, %v1564_v25  ;;  %v1614_v24 = vcombine.high %v1548_v61, %v1564_v25 }
 0x467   : > { %v1692_v26 = vrot.slane %v1684_v18, %v2418_v30  ;;  %v1699_v27 = vrot.slane %v1685_v19, %v2418_v30  ;;  %v1668_v9 = vcombine.low %v1199_v12, %v1220_v20  ;;  %v1669_v10 = vcombine.high %v1199_v12, %v1220_v20 }
 0x468   : > { %v1605_v28 = vrot.slane %v1597_v21, %v2429_v37  ;;  %v1612_v53 = vrot.slane %v1598_v22, %v2429_v37  ;;  %v1621_v49 = vrot.slane %v1613_v23, %v2429_v37  ;;  %v1628_v5 = vrot.slane %v1614_v24, %v2429_v37  ;;  %v1224_v31 = vpop.permute.xlu1 %1223 }
 0x469   : > { %v1676_v33 = vrot.slane %v1668_v9, %v2418_v30  ;;  %v1683_v34 = vrot.slane %v1669_v10, %v2418_v30  ;;  %v1413_v36 = vcombine.low %v2733_v43, %v1224_v31  ;;  %v1414_v38 = vcombine.high %v2733_v43, %v1224_v31 }
 0x46a   : > { %v1629_v39 = vcombine.low %v2725_v32, %v1605_v28  ;;  %v1630_v40 = vcombine.high %v2725_v32, %v1605_v28  ;;  %v1631_v12 = vcombine.low %v2736_v45, %v1612_v53  ;;  %v1632_v29 = vcombine.high %v2736_v45, %v1612_v53 }
 0x46b   : > { %v1633_v16 = vcombine.low %v2739_v47, %v1621_v49  ;;  %v1634_v48 = vcombine.high %v2739_v47, %v1621_v49  ;;  %v1635_v50 = vcombine.low %v2755_v57, %v1628_v5  ;;  %v1732_v52 = vcombine.low %v1676_v33, %v1692_v26 }
 0x46c   : > { %1787 = vst.msk [vmem:[%s2699_s7 + $0x50] sm:$0xff] %vm330_vm0, %v1629_v39  ;;  %1789 = vst.msk [vmem:[%s2699_s7 + $0x60] sm:$0xff] %vm330_vm0, %v1630_v40  ;;  %v1733_v32 = vcombine.high %v1676_v33, %v1692_v26  ;;  %v1748_v43 = vcombine.low %v1683_v34, %v1699_v27  ;;  %v1749_v45 = vcombine.high %v1683_v34, %v1699_v27 }
 0x46d   : > { %1791 = vst.msk [vmem:[%s2699_s7 + $0x70] sm:$0xff] %vm330_vm0, %v1631_v12  ;;  %1793 = vst.msk [vmem:[%s2699_s7 + $0x80] sm:$0xff] %vm330_vm0, %v1632_v29  ;;  %v1421_v54 = vrot.slane %v1413_v36, %v2418_v30  ;;  %v1731_v47 = vrot.slane %v1717_v11, %v2429_v37  ;;  %v1740_v56 = vrot.slane %v1732_v52, %v2429_v37 }
 0x46e   : > { %1795 = vst.msk [vmem:[%s2699_s7 + $0x90] sm:$0xff] %vm330_vm0, %v1633_v16  ;;  %1797 = vst.msk [vmem:[%s2699_s7 + $0xa0] sm:$0xff] %vm330_vm0, %v1634_v48  ;;  %v1428_v57 = vrot.slane %v1414_v38, %v2418_v30  ;;  %v1747_v60 = vrot.slane %v1733_v32, %v2429_v37  ;;  %v1756_v61 = vrot.slane %v1748_v43, %v2429_v37 }
 0x46f   : > { %1799 = vst.msk [vmem:[%s2699_s7 + $0xb0] sm:$0xff] %vm330_vm0, %v1635_v50  ;;  %v1763_v4 = vrot.slane %v1749_v45, %v2429_v37  ;;  %v1461_v42 = vcombine.low %v2776_v35, %v1421_v54  ;;  %v1764_v63 = vcombine.low %v2782_v58, %v1740_v56  ;;  %v1765_v0 = vcombine.high %v2782_v58, %v1740_v56 }
 0x470   : > { %v1462_v2 = vcombine.high %v2776_v35, %v1421_v54  ;;  %v1477_v3 = vcombine.low %v2779_v59, %v1428_v57  ;;  %v1766_v30 = vcombine.low %v2788_v17, %v1747_v60  ;;  %v1767_v62 = vcombine.high %v2788_v17, %v1747_v60 }
 0x471   : > { %v1768_v6 = vcombine.low %v1724_v55, %v1756_v61  ;;  %v1769_v8 = vcombine.high %v1724_v55, %v1756_v61  ;;  %v1770_v11 = vcombine.low %v1731_v47, %v1763_v4  ;;  %1788 = vst.msk [vmem:[%s2699_s7 + $0x58] sm:$0xff] %vm330_vm0, %v1764_v63  ;;  %1790 = vst.msk [vmem:[%s2699_s7 + $0x68] sm:$0xff] %vm330_vm0, %v1765_v0 }
 0x472   : > { %v1469_v35 = vrot.slane %v1461_v42, %v2429_v37  ;;  %v1476_v58 = vrot.slane %v1462_v2, %v2429_v37  ;;  %v1478_v13 = vcombine.high %v2779_v59, %v1428_v57  ;;  %v1453_v25 = vrot.slane %v1445_v1, %v2429_v37  ;;  %1792 = vst.msk [vmem:[%s2699_s7 + $0x78] sm:$0xff] %vm330_vm0, %v1766_v30 }
 0x473   : > { %1794 = vst.msk [vmem:[%s2699_s7 + $0x88] sm:$0xff] %vm330_vm0, %v1767_v62  ;;  %1796 = vst.msk [vmem:[%s2699_s7 + $0x98] sm:$0xff] %vm330_vm0, %v1768_v6  ;;  %v1485_v59 = vrot.slane %v1477_v3, %v2429_v37 }
 0x474   : > { %1798 = vst.msk [vmem:[%s2699_s7 + $0xa8] sm:$0xff] %vm330_vm0, %v1769_v8  ;;  %1800 = vst.msk [vmem:[%s2699_s7 + $0xb8] sm:$0xff] %vm330_vm0, %v1770_v11  ;;  %v1492_v44 = vrot.slane %v1478_v13, %v2429_v37  ;;  %v1493_v41 = vcombine.low %v2765_v46, %v1469_v35  ;;  %v1494_v1 = vcombine.high %v2765_v46, %v1469_v35 }
 0x475   : > { %v1495_v51 = vcombine.low %v2772_v7, %v1476_v58  ;;  %v1496_v15 = vcombine.high %v2772_v7, %v1476_v58  ;;  %v1497_v17 = vcombine.low %v1453_v25, %v1485_v59  ;;  %v1498_v18 = vcombine.high %v1453_v25, %v1485_v59 }
 0x476   : > { %v1499_v19 = vcombine.low %v1460_v14, %v1492_v44  ;;  %v1500_v20 = vcombine.high %v1460_v14, %v1492_v44  ;;  %1772 = vst.msk [vmem:[%s2691_s26 + $0x8] sm:$0xff] %vm330_vm0, %v1493_v41  ;;  %1774 = vst.msk [vmem:[%s2691_s26 + $0x18] sm:$0xff] %vm330_vm0, %v1494_v1 }
 0x477   : > { %1776 = vst.msk [vmem:[%s2691_s26 + $0x28] sm:$0xff] %vm330_vm0, %v1495_v51  ;;  %1778 = vst.msk [vmem:[%s2699_s7 + $0x8] sm:$0xff] %vm330_vm0, %v1496_v15  ;;  %s2109_s26 = sshll.u32 %s2247_s25, 4  ;;  %s2110_s26 = int_to_ptr.vmem [resolvable:$false] %s2109_s26 }
 0x478   : > { %1780 = vst.msk [vmem:[%s2699_s7 + $0x18] sm:$0xff] %vm330_vm0, %v1497_v17  ;;  %1782 = vst.msk [vmem:[%s2699_s7 + $0x28] sm:$0xff] %vm330_vm0, %v1498_v18  ;;  %s2111_s12 = scalar_lea.vmem %s2110_s26, 1536  ;;  %p2112_p8 = scmp.lt.s32.totalorder %s2870_s8, %s2110_s26 }
 0x479   : > { %p2113_p10 = scmp.lt.s32.totalorder %s2111_s12, %s2105_s15 }
 0x47b   : > { %p2114_p0 = por %p2113_p10, %p2112_p8 }
 0x47d   : > { %p2115_p2 = pnand %p2114_p0, %p2108_p13 }
 0x47f   : > { %2118 = shalt.err (!%p2115_p2)
}
 0x480   : > { %s2119_s20 = scalar_lea.hbm %s2851_s18, 768  ;;  %s2123_s13 = scalar_lea.hbm %s2982_s5, 1536 }
 0x481   : > { %p2120_p4 = scmp.ne.s32.totalorder %s2851_s18, %s2119_s20  ;;  %p2124_p9 = scmp.lt.u32.totalorder %s2851_s18, %s2982_s5 }
 0x482   : > { %p2125_p1 = scmp.lt.u32.totalorder %s2123_s13, %s2119_s20  ;;  %p2127_p6 = scmp.lt.u32.totalorder %s2119_s20, %s2851_s18 }
 0x483   : > { %p2121_p5 = pnand %p2120_p4, %p2990_p11 }
 0x484   : > { %p2126_p3 = por %p2125_p1, %p2124_p9 }
 0x485   : > { %p2122_p7 = pneg %p2121_p5 }
 0x486   : > { %p2128_p12 = por %p2127_p6, %p2126_p3 }
 0x488   : > { %p2129_p13 = pnand %p2128_p12, %p2122_p7 }
 0x48a   : > { %2132 = shalt.err (!%p2129_p13)
}
 0x48b   : > { %s2248_s15 = smov 128   ;;  %s2249_s26 = smov 8   ;;  %1784 = vst.msk [vmem:[%s2699_s7 + $0x38] sm:$0xff] %vm330_vm0, %v1499_v19  ;;  %1786 = vst.msk [vmem:[%s2699_s7 + $0x48] sm:$0xff] %vm330_vm0, %v1500_v20 }
 0x48c   : > { %1977 = dma.vmem_to_hbm [thread:$0]  (%p2990_p11), %s2870_s8, 768, %s2851_s18, %s1802_s28, %s2248_s15, %s2248_s15, %s2249_s26  }
 0x48d   : > { %s1807_s12 = scalar_lea.sflag [#allocation7], %s2390_s29  ;;  %s2133_s20 = scalar_lea.vmem %s2893_s19, 3072 }
 0x48e   : > { %p2134_p8 = scmp.ne.s32.totalorder %s2893_s19, %s2133_s20  ;;  %s2250_s11 = smov [#allocation6]  }
 0x48f   : > { %s2137_s16 = sshll.u32 %s2250_s11, 4  ;;  %s2138_s16 = int_to_ptr.vmem [resolvable:$false] %s2137_s16 }
 0x490   : > { %p2135_p10 = pnand %p2134_p8, %p2990_p11  ;;  %s2139_s13 = scalar_lea.vmem %s2138_s16, 6144 }
 0x491   : > { %p2140_p2 = scmp.lt.s32.totalorder %s2893_s19, %s2138_s16  ;;  %p2141_p4 = scmp.lt.s32.totalorder %s2139_s13, %s2133_s20 }
 0x492   : > { %p2136_p0 = pneg %p2135_p10 }
 0x493   : > { %p2142_p5 = por %p2141_p4, %p2140_p2 }
 0x495   : > { %p2143_p7 = pnand %p2142_p5, %p2136_p0 }
 0x497   : > { %2146 = shalt.err (!%p2143_p7)
}
 0x498   : > { %s2147_s7 = scalar_lea.hbm %s2891_s17, 3072  ;;  %s2151_s28 = scalar_lea.hbm %s2983_s6, 6144 }
 0x499   : > { %p2148_p9 = scmp.ne.s32.totalorder %s2891_s17, %s2147_s7  ;;  %p2152_p6 = scmp.lt.u32.totalorder %s2891_s17, %s2983_s6 }
 0x49a   : > { %p2153_p12 = scmp.lt.u32.totalorder %s2151_s28, %s2147_s7  ;;  %p2155_p8 = scmp.lt.u32.totalorder %s2147_s7, %s2891_s17 }
 0x49b   : > { %p2149_p1 = pnand %p2148_p9, %p2990_p11 }
 0x49c   : > { %p2154_p13 = por %p2153_p12, %p2152_p6 }
 0x49d   : > { %p2150_p3 = pneg %p2149_p1 }
 0x49e   : > { %p2156_p10 = por %p2155_p8, %p2154_p13 }
 0x4a0   : > { %p2157_p0 = pnand %p2156_p10, %p2150_p3 }
 0x4a2   : > { %2160 = shalt.err (!%p2157_p0)
}
 0x4a3   : > { %1978 = dma.vmem_to_hbm [thread:$0]  (%p2990_p11), %s2893_s19, 3072, %s2891_s17, %s1807_s12, %s2248_s15, %s2248_s15, %s2249_s26  }
 0x4a4 PF: > { %s1851_s20 = sand.u32 1, %s2191_s21   ;;  %p2991_p2 = scmp.ne.s32.totalorder %s2988_s10, 0 }
 0x4a5   : > { %p2992_p4 = scmp.ge.s32.totalorder %s2203_s24, 2  ;;  %s1852_s11 = scalar_lea.sflag [#allocation4], %s1851_s20 }
 0x4a7   : > { %p1986_p5 = pnand %p2992_p4, %p2991_p2 }
 0x4a9   : > { %2182 = dma.done.wait (!%p1986_p5), %s1852_s11, 768  }
 0x4aa   : > { %2184 = vsyncadd (!%p1986_p5), %s1852_s11, 4294966528  ;;  %s1861_s9 = scalar_lea.sflag [#allocation7], %s1851_s20 }
 0x4ab   : > { %2186 = dma.done.wait (!%p1986_p5), %s1861_s9, 3072  }
 0x4ac   : > { %2188 = vsyncadd (!%p1986_p5), %s1861_s9, 4294964224  ;;  %p23_p11 = scmp.ge.s32.totalorder %s2311_s27, 4   ;;  %s2993_s21 = smov %s2195_s22 }
 0x4ad   : > { %s2994_s22 = smov %s2199_s23  ;;  %s2995_s23 = smov %s2323_s30 }
 0x4ae   : > { %s2996_s24 = smov %s2311_s27  ;;  %25 = sbr.rel (!%p23_p11) target bundleno = 7 (0x7), region = 102 }
 0x4b5   :  { %1866 = vsyncpa [#allocation3], 1 }
 0x4b6   :  { %1868 = vsyncpa [#allocation3 + $0x1], 1 }
 0x4b7   :  { %1869 = vsyncpa [#allocation4], 1 }
 0x4b8   :  { %1871 = vsyncpa [#allocation4 + $0x1], 1 }
 0x4b9   :  { %1872 = vsyncpa [#allocation7], 1 }
 0x4ba   :  { %1874 = vsyncpa [#allocation7 + $0x1], 1 }

</bundles_post_ra>
